<compile_context>
chip_gen: v5e
topology: v5e:2x2
jax: 0.10.0
libtpu: 0.0.40
codegen_flags: <defaults>
</compile_context>

<pallas_src>
import math
import functools

import jax
import jax.numpy as jnp
from jax import lax
from jax.experimental import pallas as pl
from jax.experimental.pallas import tpu as pltpu

_NEG_INF = -1e30          # finite mask fill (scores stay in f32)


def _tile(dim, target):
    """Largest tile dividing `dim`, capped at power-of-two `target`."""
    return math.gcd(dim, target)


@functools.lru_cache(maxsize=1)
def _vmem_limit_bytes():
    """Scoped VMEM limit derived per TPU generation (safe fallback)."""
    try:
        cap = int(pltpu.get_tpu_info().vmem_capacity_bytes)
    except Exception:
        cap = 128 * 1024 * 1024
    return max(32 * 1024 * 1024, min(cap - 16 * 1024 * 1024, 100 * 1024 * 1024))


# ---------------------------------------------------------------------------
# Kernel 1: fused QKV projection (single concatenated weight) + RoPE epilogue.
#   grid = (M//tm, H//tk) with M = B*S flattened; K-reduction trailing axis.
#   RoPE uses the half-split form: [a1*c - a2*s, a2*c + a1*s] per head, on the
#   f32 accumulator, at the last reduction step.  Q is pre-scaled by sm_scale.
# ---------------------------------------------------------------------------
def _qkv_rope_kernel(x_ref, w_ref, cos_ref, sin_ref,
                     q_ref, k_ref, v_ref, acc_ref,
                     *, head_dim, num_q_heads, num_kv_heads, sm_scale):
    kk = pl.program_id(1)

    @pl.when(kk == 0)
    def _init():
        acc_ref[...] = jnp.zeros_like(acc_ref)

    # bf16 x @ bf16 [Wq|Wk|Wv] with f32 MXU accumulation.
    acc_ref[...] += jnp.dot(x_ref[...], w_ref[...],
                            preferred_element_type=jnp.float32)

    @pl.when(kk == pl.num_programs(1) - 1)
    def _finalize():
        half = head_dim // 2
        nq = num_q_heads * head_dim
        nkv = num_kv_heads * head_dim
        cos_h = cos_ref[...]                       # (tm, half) f32
        sin_h = sin_ref[...]                       # (tm, half) f32

        def rope(off):
            a = acc_ref[:, off:off + head_dim]     # aligned 128-lane ref load
            a1, a2 = a[:, :half], a[:, half:]
            return jnp.concatenate(
                [a1 * cos_h - a2 * sin_h, a2 * cos_h + a1 * sin_h], axis=-1)

        for h in range(num_q_heads):
            off = h * head_dim
            q_ref[:, off:off + head_dim] = (
                rope(off) * sm_scale).astype(q_ref.dtype)
        for h in range(num_kv_heads):
            off = h * head_dim
            k_ref[:, off:off + head_dim] = rope(nq + off).astype(k_ref.dtype)
        v_ref[...] = acc_ref[:, nq + nkv:].astype(v_ref.dtype)


def pallas_qkv_rope_proj(x, w_qkv, cos_h, sin_h, *,
                         head_dim, num_q_heads, num_kv_heads, sm_scale):
    """x:(B,S,H) bf16; w_qkv:(H, Nq+2*Nkv) bf16; cos/sin:(S, D/2) f32."""
    B, S, H = x.shape
    M = B * S
    nq = num_q_heads * head_dim
    nkv = num_kv_heads * head_dim
    ntot = nq + 2 * nkv
    assert w_qkv.shape == (H, ntot)

    tm = _tile(S, 256)            # divides S so (B,S) flattening keeps RoPE rows
    tk = _tile(H, 512)
    n_s_tiles = S // tm
    grid = (M // tm, H // tk)

    kernel = functools.partial(
        _qkv_rope_kernel, head_dim=head_dim, num_q_heads=num_q_heads,
        num_kv_heads=num_kv_heads, sm_scale=sm_scale)

    flops = 2 * M * H * ntot
    bytes_accessed = (2 * (M * H + (M // tm) * H * ntot + M * ntot)
                      + 4 * 2 * S * (head_dim // 2))

    q, k, v = pl.pallas_call(
        kernel,
        out_shape=(
            jax.ShapeDtypeStruct((M, nq), jnp.bfloat16),
            jax.ShapeDtypeStruct((M, nkv), jnp.bfloat16),
            jax.ShapeDtypeStruct((M, nkv), jnp.bfloat16),
        ),
        grid_spec=pltpu.PrefetchScalarGridSpec(
            num_scalar_prefetch=0,
            grid=grid,
            in_specs=[
                pl.BlockSpec((tm, tk), lambda m, kk: (m, kk)),
                pl.BlockSpec((tk, ntot), lambda m, kk: (kk, 0)),
                pl.BlockSpec((tm, head_dim // 2),
                             lambda m, kk: (m % n_s_tiles, 0)),
                pl.BlockSpec((tm, head_dim // 2),
                             lambda m, kk: (m % n_s_tiles, 0)),
            ],
            out_specs=(
                pl.BlockSpec((tm, nq), lambda m, kk: (m, 0)),
                pl.BlockSpec((tm, nkv), lambda m, kk: (m, 0)),
                pl.BlockSpec((tm, nkv), lambda m, kk: (m, 0)),
            ),
            scratch_shapes=[pltpu.VMEM((tm, ntot), jnp.float32)],
        ),
        compiler_params=pltpu.CompilerParams(
            dimension_semantics=("parallel", "arbitrary"),
            vmem_limit_bytes=_vmem_limit_bytes(),
        ),
        cost_estimate=pl.CostEstimate(
            flops=int(flops), transcendentals=0,
            bytes_accessed=int(bytes_accessed)),
    )(x.reshape(M, H), w_qkv, cos_h, sin_h)

    return (q.reshape(B, S, nq), k.reshape(B, S, nkv), v.reshape(B, S, nkv))


# ---------------------------------------------------------------------------
# Kernel 2: flash-style causal attention with GQA grouping.
#   grid = (B, Hkv, q_block, kv_block) (kv axis trailing, "arbitrary").
#   One grid step handles one GQA group; K/V fetched once per group.  Masked
#   kv blocks are skipped with pl.when and their K/V DMA is elided by clamping
#   the index_map to min(ki, qi).  The causal mask is built only on the
#   diagonal block, which also finalizes the output.
# ---------------------------------------------------------------------------
def _flash_attn_kernel(q_ref, k_ref, v_ref, o_ref, m_ref, l_ref, acc_ref,
                       *, group, head_dim, block):
    qi = pl.program_id(2)
    ki = pl.program_id(3)

    @pl.when(ki == 0)
    def _init():
        m_ref[...] = jnp.full_like(m_ref, _NEG_INF)
        l_ref[...] = jnp.zeros_like(l_ref)
        acc_ref[...] = jnp.zeros_like(acc_ref)

    def step(on_diagonal):
        k = k_ref[0]                                   # (blk, D) bf16
        v = v_ref[0]                                   # (blk, D) bf16
        if on_diagonal:
            row = lax.broadcasted_iota(jnp.int32, (block, block), 0)
            col = lax.broadcasted_iota(jnp.int32, (block, block), 1)
            causal = col <= row
        for j in range(group):
            sl = slice(j * head_dim, (j + 1) * head_dim)
            qj = q_ref[0, :, sl]                       # bf16, pre-scaled by 1/sqrt(D)
            # contract on last dims (q @ k.T) without an explicit transpose
            s = lax.dot_general(qj, k, (((1,), (1,)), ((), ())),
                                preferred_element_type=jnp.float32)
            if on_diagonal:
                s = jnp.where(causal, s, _NEG_INF)
            m_prev = m_ref[j]                          # (blk, 1)
            m_new = jnp.maximum(m_prev, jnp.max(s, axis=-1, keepdims=True))
            alpha = jnp.exp(m_prev - m_new)
            p = jnp.exp(s - m_new)
            l_ref[j] = alpha * l_ref[j] + jnp.sum(p, axis=-1, keepdims=True)
            acc_ref[j] = alpha * acc_ref[j] + jnp.dot(
                p.astype(jnp.bfloat16), v, preferred_element_type=jnp.float32)
            m_ref[j] = m_new

    @pl.when(ki < qi)              # interior blocks: no mask work at all
    def _interior():
        step(False)

    @pl.when(ki == qi)             # diagonal block: masked, then finalize
    def _diag():
        step(True)
        for j in range(group):
            sl = slice(j * head_dim, (j + 1) * head_dim)
            inv = 1.0 / l_ref[j]
            o_ref[0, :, sl] = (acc_ref[j] * inv).astype(o_ref.dtype)


def pallas_flash_attention_gqa(q, k, v, *, num_q_heads, num_kv_heads, head_dim):
    """q:(B,S,Hq*D) (RoPE'd, pre-scaled); k,v:(B,S,Hkv*D) -> (B,S,Hq*D) bf16."""
    B, S, Nq = q.shape
    group = num_q_heads // num_kv_heads
    gD = group * head_dim
    blk = _tile(S, 256)            # 256 fills the 256x256 MXU on v6e/v7x
    n_blk = S // blk

    kernel = functools.partial(
        _flash_attn_kernel, group=group, head_dim=head_dim, block=blk)

    flops = 2 * B * num_q_heads * S * S * head_dim      # causal ~halves this
    transcendentals = B * num_q_heads * S * S // 2
    kv_blocks_read = B * num_kv_heads * n_blk * (n_blk + 1) // 2
    bytes_accessed = 2 * (2 * B * S * Nq
                          + 2 * kv_blocks_read * blk * head_dim)

    return pl.pallas_call(
        kernel,
        out_shape=jax.ShapeDtypeStruct((B, S, Nq), jnp.bfloat16),
        grid_spec=pltpu.PrefetchScalarGridSpec(
            num_scalar_prefetch=0,
            grid=(B, num_kv_heads, n_blk, n_blk),
            in_specs=[
                pl.BlockSpec((1, blk, gD), lambda b, h, qi, ki: (b, qi, h)),
                # clamp masked blocks to the previous index -> DMA elided
                pl.BlockSpec((1, blk, head_dim),
                             lambda b, h, qi, ki: (b, jnp.minimum(ki, qi), h)),
                pl.BlockSpec((1, blk, head_dim),
                             lambda b, h, qi, ki: (b, jnp.minimum(ki, qi), h)),
            ],
            out_specs=pl.BlockSpec((1, blk, gD), lambda b, h, qi, ki: (b, qi, h)),
            scratch_shapes=[
                pltpu.VMEM((group, blk, 1), jnp.float32),        # running max
                pltpu.VMEM((group, blk, 1), jnp.float32),        # running sum
                pltpu.VMEM((group, blk, head_dim), jnp.float32), # acc
            ],
        ),
        compiler_params=pltpu.CompilerParams(
            dimension_semantics=("parallel", "parallel", "parallel", "arbitrary"),
            vmem_limit_bytes=_vmem_limit_bytes(),
        ),
        cost_estimate=pl.CostEstimate(
            flops=int(flops), transcendentals=int(transcendentals),
            bytes_accessed=int(bytes_accessed)),
    )(q, k, v)


# ---------------------------------------------------------------------------
# Kernel 3: output projection (flattened-M, tiled K-reduction, bf16 streams).
# ---------------------------------------------------------------------------
def _proj_kernel(x_ref, w_ref, o_ref, acc_ref):
    kk = pl.program_id(1)

    @pl.when(kk == 0)
    def _init():
        acc_ref[...] = jnp.zeros_like(acc_ref)

    acc_ref[...] += jnp.dot(x_ref[...], w_ref[...],
                            preferred_element_type=jnp.float32)

    @pl.when(kk == pl.num_programs(1) - 1)
    def _finalize():
        o_ref[...] = acc_ref[...].astype(o_ref.dtype)


def pallas_out_proj(x, w, out_dtype):
    """x: (B, S, K) bf16 @ w: (K, N) bf16 -> (B, S, N) out_dtype."""
    B, S, K = x.shape
    N = w.shape[1]
    M = B * S
    tm = _tile(M, 256)
    tk = _tile(K, 512)
    grid = (M // tm, K // tk)

    flops = 2 * M * K * N
    bytes_accessed = 2 * (M * K + (M // tm) * K * N) + 4 * M * N

    out = pl.pallas_call(
        _proj_kernel,
        out_shape=jax.ShapeDtypeStruct((M, N), out_dtype),
        grid_spec=pltpu.PrefetchScalarGridSpec(
            num_scalar_prefetch=0,
            grid=grid,
            in_specs=[
                pl.BlockSpec((tm, tk), lambda m, kk: (m, kk)),
                pl.BlockSpec((tk, N), lambda m, kk: (kk, 0)),
            ],
            out_specs=pl.BlockSpec((tm, N), lambda m, kk: (m, 0)),
            scratch_shapes=[pltpu.VMEM((tm, N), jnp.float32)],
        ),
        compiler_params=pltpu.CompilerParams(
            dimension_semantics=("parallel", "arbitrary"),
            vmem_limit_bytes=_vmem_limit_bytes(),
        ),
        cost_estimate=pl.CostEstimate(
            flops=int(flops), transcendentals=0,
            bytes_accessed=int(bytes_accessed)),
    )(x.reshape(M, K), w)
    return out.reshape(B, S, N)


# ---------------------------------------------------------------------------
# Module wrapper (plain-JAX glue around the Pallas kernels).
# ---------------------------------------------------------------------------
class MistralSdpaAttentionPallas:
    def __init__(self, hidden_size, num_heads, head_dim, num_kv_heads,
                 rope_theta=10000.0, key=None):
        assert num_heads % num_kv_heads == 0
        assert head_dim % 128 == 0, "kernel layout assumes lane-aligned head_dim"
        assert hidden_size % 128 == 0

        self.hidden_size = hidden_size
        self.num_heads = num_heads
        self.head_dim = head_dim
        self.num_key_value_heads = num_kv_heads
        self.num_key_value_groups = num_heads // num_kv_heads
        self.rope_theta = rope_theta

        key = jax.random.PRNGKey(0) if key is None else key
        kq, kk, kv, ko = jax.random.split(key, 4)
        hs = hidden_size
        qd = num_heads * head_dim
        kvd = num_kv_heads * head_dim
        u = lambda k, shape, fan: (
            jax.random.uniform(k, shape, jnp.float32, -1.0, 1.0) / math.sqrt(fan)
        )
        # torch weights are (1, in, out); squeeze the broadcast batch dim.
        self.q_weight = u(kq, (hs, qd), hs)
        self.k_weight = u(kk, (hs, kvd), hs)
        self.v_weight = u(kv, (hs, kvd), hs)
        self.o_weight = u(ko, (qd, hs), qd)

        # bf16 copies for the kernels: cast/concat ONCE, not per grid step.
        self.qkv_weight_bf16 = jnp.concatenate(
            [self.q_weight, self.k_weight, self.v_weight], axis=1
        ).astype(jnp.bfloat16)
        self.o_weight_bf16 = self.o_weight.astype(jnp.bfloat16)

    def _rope_tables(self, seq_len, position_ids=None):
        # TODO(synk): per-batch position_ids (2D) not supported; shared 1D only.
        d = self.head_dim
        inv_freq = 1.0 / (
            self.rope_theta ** (jnp.arange(0, d, 2, dtype=jnp.float32) / d)
        )
        if position_ids is None:
            pos = jnp.arange(seq_len, dtype=jnp.float32)
        else:
            pos = jnp.asarray(position_ids, jnp.float32).reshape(-1)[:seq_len]
        freqs = pos[:, None] * inv_freq[None, :]            # (S, D/2)
        emb = jnp.concatenate([freqs, freqs], axis=-1)      # (S, D)
        return jnp.cos(emb), jnp.sin(emb)

    def __call__(self, hidden_states, position_ids=None):
        bsz, q_len, _ = hidden_states.shape
        assert q_len % 8 == 0, "sequence length must be a multiple of 8"

        half = self.head_dim // 2
        cos, sin = self._rope_tables(q_len, position_ids)
        cos_h, sin_h = cos[:, :half], sin[:, :half]          # halves are identical
        sm_scale = 1.0 / math.sqrt(self.head_dim)

        x = hidden_states.astype(jnp.bfloat16)               # one cast in HBM

        q, k, v = pallas_qkv_rope_proj(
            x, self.qkv_weight_bf16, cos_h, sin_h,
            head_dim=self.head_dim,
            num_q_heads=self.num_heads,
            num_kv_heads=self.num_key_value_heads,
            sm_scale=sm_scale)

        attn = pallas_flash_attention_gqa(
            q, k, v,
            num_q_heads=self.num_heads,
            num_kv_heads=self.num_key_value_heads,
            head_dim=self.head_dim)                           # (B, S, Hq*D) bf16

        return pallas_out_proj(attn, self.o_weight_bf16, hidden_states.dtype)


# ---------------------------------------------------------------------------
# Pure-JAX f32 reference (sanity check).
# ---------------------------------------------------------------------------
def reference_forward(mod, x, position_ids=None):
    bsz, q_len, _ = x.shape
    q = jnp.einsum("bsh,hd->bsd", x, mod.q_weight)
    k = jnp.einsum("bsh,hd->bsd", x, mod.k_weight)
    v = jnp.einsum("bsh,hd->bsd", x, mod.v_weight)
    q = q.reshape(bsz, q_len, mod.num_heads, mod.head_dim).transpose(0, 2, 1, 3)
    k = k.reshape(bsz, q_len, mod.num_key_value_heads, mod.head_dim).transpose(0, 2, 1, 3)
    v = v.reshape(bsz, q_len, mod.num_key_value_heads, mod.head_dim).transpose(0, 2, 1, 3)
    cos, sin = mod._rope_tables(q_len, position_ids)

    def rot_half(t):
        h = t.shape[-1] // 2
        return jnp.concatenate([-t[..., h:], t[..., :h]], axis=-1)

    q = q * cos + rot_half(q) * sin
    k = k * cos + rot_half(k) * sin
    k = jnp.repeat(k, mod.num_key_value_groups, axis=1)
    v = jnp.repeat(v, mod.num_key_value_groups, axis=1)

    scale = 1.0 / math.sqrt(mod.head_dim)
    s = jnp.einsum("bhqd,bhkd->bhqk", q, k) * scale
    mask = jnp.tril(jnp.ones((q_len, q_len), bool))
    s = jnp.where(mask, s, -1e30)
    p = jax.nn.softmax(s, axis=-1)
    o = jnp.einsum("bhqk,bhkd->bhqd", p, v)
    o = o.transpose(0, 2, 1, 3).reshape(bsz, q_len, -1)
    return jnp.einsum("bsd,dh->bsh", o, mod.o_weight)


if __name__ == "__main__":
    # Small GQA config: hidden=256, 4 query heads, 2 kv heads (groups=2),
    # head_dim=128 (lane-aligned, as in real Mistral), batch=2, seq=16.
    B, S, H = 2, 16, 256
    num_heads, head_dim, num_kv_heads = 4, 128, 2

    key = jax.random.PRNGKey(0)
    kx, kw = jax.random.split(key)
    x = jax.random.normal(kx, (B, S, H), dtype=jnp.float32)

    mod = MistralSdpaAttentionPallas(
        hidden_size=H,
        num_heads=num_heads,
        head_dim=head_dim,
        num_kv_heads=num_kv_heads,
        rope_theta=10000.0,
        key=kw,
    )

    out = jax.block_until_ready(mod(x))
    ref = reference_forward(mod, x)

    assert out.shape == (B, S, H), out.shape
    # bf16 MXU inputs / bf16 intermediates (f32 accumulation) vs. f32 reference.
    max_err = float(jnp.max(jnp.abs(out - ref)))
    assert jnp.allclose(out, ref, atol=6e-2, rtol=6e-2), max_err
    print("KERNEL_OK")
</pallas_src>

<mosaic_0001>
module attributes {stable_mosaic.version = 11 : i64} {
  func.func @_qkv_rope_kernel(%arg0: i32, %arg1: i32, %arg2: memref<16x256xbf16, #tpu.memory_space<vmem>>, %arg3: memref<256x1024xbf16, #tpu.memory_space<vmem>>, %arg4: memref<16x64xf32, #tpu.memory_space<vmem>>, %arg5: memref<16x64xf32, #tpu.memory_space<vmem>>, %arg6: memref<16x512xbf16, #tpu.memory_space<vmem>>, %arg7: memref<16x256xbf16, #tpu.memory_space<vmem>>, %arg8: memref<16x256xbf16, #tpu.memory_space<vmem>>, %arg9: memref<16x1024xf32, #tpu.memory_space<vmem>>) attributes {dimension_semantics = [#tpu.dimension_semantics<parallel>, #tpu.dimension_semantics<arbitrary>], iteration_bounds = array<i64: 2, 1>, scalar_prefetch = 0 : i64, scratch_operands = 1 : i64, tpu.core_type = #tpu.core_type<tc>, window_params = [{transform_indices = @transform_0, window_bounds = array<i64: 16, 256>}, {transform_indices = @transform_1, window_bounds = array<i64: 256, 1024>}, {transform_indices = @transform_2, window_bounds = array<i64: 16, 64>}, {transform_indices = @transform_3, window_bounds = array<i64: 16, 64>}, {transform_indices = @transform_4, window_bounds = array<i64: 16, 512>}, {transform_indices = @transform_5, window_bounds = array<i64: 16, 256>}, {transform_indices = @transform_6, window_bounds = array<i64: 16, 256>}]} {
    %c0_i32 = arith.constant 0 : i32
    %0 = arith.cmpi eq, %arg1, %c0_i32 : i32
    %1 = arith.extui %0 : i1 to i32
    %c0_i32_0 = arith.constant 0 : i32
    %2 = arith.cmpi ne, %1, %c0_i32_0 : i32
    scf.if %2 {
      %cst_10 = arith.constant 0.000000e+00 : f32
      %12 = vector.broadcast %cst_10 : f32 to vector<16x1024xf32>
      %c0_11 = arith.constant 0 : index
      %c0_12 = arith.constant 0 : index
      %13 = vector.load %arg9[%c0_11, %c0_12] : memref<16x1024xf32, #tpu.memory_space<vmem>>, vector<16x1024xf32>
      tpu.vector_store %arg9[%c0_11, %c0_12], %12 {strides = array<i32>} : memref<16x1024xf32, #tpu.memory_space<vmem>>, vector<16x1024xf32>,
    } else {
    }
    %c0 = arith.constant 0 : index
    %c0_1 = arith.constant 0 : index
    %3 = vector.load %arg9[%c0, %c0_1] : memref<16x1024xf32, #tpu.memory_space<vmem>>, vector<16x1024xf32>
    %c0_2 = arith.constant 0 : index
    %c0_3 = arith.constant 0 : index
    %4 = vector.load %arg2[%c0_2, %c0_3] : memref<16x256xbf16, #tpu.memory_space<vmem>>, vector<16x256xbf16>
    %c0_4 = arith.constant 0 : index
    %c0_5 = arith.constant 0 : index
    %5 = vector.load %arg3[%c0_4, %c0_5] : memref<256x1024xbf16, #tpu.memory_space<vmem>>, vector<256x1024xbf16>
    %cst = arith.constant dense<0.000000e+00> : vector<16x1024xf32>
    %6 = tpu.matmul %4, %5, %cst {dimension_numbers = #tpu.dot_dimension_numbers<[1], [0], [0], [1], [0, 0, 1, 1], [], []>} : vector<16x256xbf16>, vector<256x1024xbf16>, vector<16x1024xf32> -> vector<16x1024xf32>
    %7 = arith.addf %3, %6 : vector<16x1024xf32>
    %c0_6 = arith.constant 0 : index
    %c0_7 = arith.constant 0 : index
    %8 = vector.load %arg9[%c0_6, %c0_7] : memref<16x1024xf32, #tpu.memory_space<vmem>>, vector<16x1024xf32>
    tpu.vector_store %arg9[%c0_6, %c0_7], %7 {strides = array<i32>} : memref<16x1024xf32, #tpu.memory_space<vmem>>, vector<16x1024xf32>,
    %c0_i32_8 = arith.constant 0 : i32
    %9 = arith.cmpi eq, %arg1, %c0_i32_8 : i32
    %10 = arith.extui %9 : i1 to i32
    %c0_i32_9 = arith.constant 0 : i32
    %11 = arith.cmpi ne, %10, %c0_i32_9 : i32
    scf.if %11 {
      %c0_10 = arith.constant 0 : index
      %c0_11 = arith.constant 0 : index
      %12 = vector.load %arg4[%c0_10, %c0_11] : memref<16x64xf32, #tpu.memory_space<vmem>>, vector<16x64xf32>
      %c0_12 = arith.constant 0 : index
      %c0_13 = arith.constant 0 : index
      %13 = vector.load %arg5[%c0_12, %c0_13] : memref<16x64xf32, #tpu.memory_space<vmem>>, vector<16x64xf32>
      %c0_14 = arith.constant 0 : index
      %c0_15 = arith.constant 0 : index
      %14 = vector.load %arg9[%c0_14, %c0_15] : memref<16x1024xf32, #tpu.memory_space<vmem>>, vector<16x128xf32>
      %15 = vector.extract_strided_slice %14 {offsets = [0, 0], sizes = [16, 64], strides = [1, 1]} : vector<16x128xf32> to vector<16x64xf32>
      %16 = vector.extract_strided_slice %14 {offsets = [0, 64], sizes = [16, 64], strides = [1, 1]} : vector<16x128xf32> to vector<16x64xf32>
      %17 = arith.mulf %15, %12 : vector<16x64xf32>
      %18 = arith.mulf %16, %13 : vector<16x64xf32>
      %19 = arith.subf %17, %18 : vector<16x64xf32>
      %20 = arith.mulf %16, %12 : vector<16x64xf32>
      %21 = arith.mulf %15, %13 : vector<16x64xf32>
      %22 = arith.addf %20, %21 : vector<16x64xf32>
      %23 = tpu.concatenate %19, %22 in 1 : vector<16x64xf32>, vector<16x64xf32> -> vector<16x128xf32>
      %cst_16 = arith.constant 0.0883883461 : f32
      %24 = vector.broadcast %cst_16 : f32 to vector<16x128xf32>
      %25 = arith.mulf %23, %24 : vector<16x128xf32>
      %26 = arith.truncf %25 : vector<16x128xf32> to vector<16x128xbf16>
      %c0_17 = arith.constant 0 : index
      %c0_18 = arith.constant 0 : index
      %27 = vector.load %arg6[%c0_17, %c0_18] : memref<16x512xbf16, #tpu.memory_space<vmem>>, vector<16x128xbf16>
      tpu.vector_store %arg6[%c0_17, %c0_18], %26 {strides = array<i32>} : memref<16x512xbf16, #tpu.memory_space<vmem>>, vector<16x128xbf16>,
      %c0_19 = arith.constant 0 : index
      %c128 = arith.constant 128 : index
      %28 = vector.load %arg9[%c0_19, %c128] : memref<16x1024xf32, #tpu.memory_space<vmem>>, vector<16x128xf32>
      %29 = vector.extract_strided_slice %28 {offsets = [0, 0], sizes = [16, 64], strides = [1, 1]} : vector<16x128xf32> to vector<16x64xf32>
      %30 = vector.extract_strided_slice %28 {offsets = [0, 64], sizes = [16, 64], strides = [1, 1]} : vector<16x128xf32> to vector<16x64xf32>
      %31 = arith.mulf %29, %12 : vector<16x64xf32>
      %32 = arith.mulf %30, %13 : vector<16x64xf32>
      %33 = arith.subf %31, %32 : vector<16x64xf32>
      %34 = arith.mulf %30, %12 : vector<16x64xf32>
      %35 = arith.mulf %29, %13 : vector<16x64xf32>
      %36 = arith.addf %34, %35 : vector<16x64xf32>
      %37 = tpu.concatenate %33, %36 in 1 : vector<16x64xf32>, vector<16x64xf32> -> vector<16x128xf32>
      %cst_20 = arith.constant 0.0883883461 : f32
      %38 = vector.broadcast %cst_20 : f32 to vector<16x128xf32>
      %39 = arith.mulf %37, %38 : vector<16x128xf32>
      %40 = arith.truncf %39 : vector<16x128xf32> to vector<16x128xbf16>
      %c0_21 = arith.constant 0 : index
      %c128_22 = arith.constant 128 : index
      %41 = vector.load %arg6[%c0_21, %c128_22] : memref<16x512xbf16, #tpu.memory_space<vmem>>, vector<16x128xbf16>
      tpu.vector_store %arg6[%c0_21, %c128_22], %40 {strides = array<i32>} : memref<16x512xbf16, #tpu.memory_space<vmem>>, vector<16x128xbf16>,
      %c0_23 = arith.constant 0 : index
      %c256 = arith.constant 256 : index
      %42 = vector.load %arg9[%c0_23, %c256] : memref<16x1024xf32, #tpu.memory_space<vmem>>, vector<16x128xf32>
      %43 = vector.extract_strided_slice %42 {offsets = [0, 0], sizes = [16, 64], strides = [1, 1]} : vector<16x128xf32> to vector<16x64xf32>
      %44 = vector.extract_strided_slice %42 {offsets = [0, 64], sizes = [16, 64], strides = [1, 1]} : vector<16x128xf32> to vector<16x64xf32>
      %45 = arith.mulf %43, %12 : vector<16x64xf32>
      %46 = arith.mulf %44, %13 : vector<16x64xf32>
      %47 = arith.subf %45, %46 : vector<16x64xf32>
      %48 = arith.mulf %44, %12 : vector<16x64xf32>
      %49 = arith.mulf %43, %13 : vector<16x64xf32>
      %50 = arith.addf %48, %49 : vector<16x64xf32>
      %51 = tpu.concatenate %47, %50 in 1 : vector<16x64xf32>, vector<16x64xf32> -> vector<16x128xf32>
      %cst_24 = arith.constant 0.0883883461 : f32
      %52 = vector.broadcast %cst_24 : f32 to vector<16x128xf32>
      %53 = arith.mulf %51, %52 : vector<16x128xf32>
      %54 = arith.truncf %53 : vector<16x128xf32> to vector<16x128xbf16>
      %c0_25 = arith.constant 0 : index
      %c256_26 = arith.constant 256 : index
      %55 = vector.load %arg6[%c0_25, %c256_26] : memref<16x512xbf16, #tpu.memory_space<vmem>>, vector<16x128xbf16>
      tpu.vector_store %arg6[%c0_25, %c256_26], %54 {strides = array<i32>} : memref<16x512xbf16, #tpu.memory_space<vmem>>, vector<16x128xbf16>,
      %c0_27 = arith.constant 0 : index
      %c384 = arith.constant 384 : index
      %56 = vector.load %arg9[%c0_27, %c384] : memref<16x1024xf32, #tpu.memory_space<vmem>>, vector<16x128xf32>
      %57 = vector.extract_strided_slice %56 {offsets = [0, 0], sizes = [16, 64], strides = [1, 1]} : vector<16x128xf32> to vector<16x64xf32>
      %58 = vector.extract_strided_slice %56 {offsets = [0, 64], sizes = [16, 64], strides = [1, 1]} : vector<16x128xf32> to vector<16x64xf32>
      %59 = arith.mulf %57, %12 : vector<16x64xf32>
      %60 = arith.mulf %58, %13 : vector<16x64xf32>
      %61 = arith.subf %59, %60 : vector<16x64xf32>
      %62 = arith.mulf %58, %12 : vector<16x64xf32>
      %63 = arith.mulf %57, %13 : vector<16x64xf32>
      %64 = arith.addf %62, %63 : vector<16x64xf32>
      %65 = tpu.concatenate %61, %64 in 1 : vector<16x64xf32>, vector<16x64xf32> -> vector<16x128xf32>
      %cst_28 = arith.constant 0.0883883461 : f32
      %66 = vector.broadcast %cst_28 : f32 to vector<16x128xf32>
      %67 = arith.mulf %65, %66 : vector<16x128xf32>
      %68 = arith.truncf %67 : vector<16x128xf32> to vector<16x128xbf16>
      %c0_29 = arith.constant 0 : index
      %c384_30 = arith.constant 384 : index
      %69 = vector.load %arg6[%c0_29, %c384_30] : memref<16x512xbf16, #tpu.memory_space<vmem>>, vector<16x128xbf16>
      tpu.vector_store %arg6[%c0_29, %c384_30], %68 {strides = array<i32>} : memref<16x512xbf16, #tpu.memory_space<vmem>>, vector<16x128xbf16>,
      %c0_31 = arith.constant 0 : index
      %c512 = arith.constant 512 : index
      %70 = vector.load %arg9[%c0_31, %c512] : memref<16x1024xf32, #tpu.memory_space<vmem>>, vector<16x128xf32>
      %71 = vector.extract_strided_slice %70 {offsets = [0, 0], sizes = [16, 64], strides = [1, 1]} : vector<16x128xf32> to vector<16x64xf32>
      %72 = vector.extract_strided_slice %70 {offsets = [0, 64], sizes = [16, 64], strides = [1, 1]} : vector<16x128xf32> to vector<16x64xf32>
      %73 = arith.mulf %71, %12 : vector<16x64xf32>
      %74 = arith.mulf %72, %13 : vector<16x64xf32>
      %75 = arith.subf %73, %74 : vector<16x64xf32>
      %76 = arith.mulf %72, %12 : vector<16x64xf32>
      %77 = arith.mulf %71, %13 : vector<16x64xf32>
      %78 = arith.addf %76, %77 : vector<16x64xf32>
      %79 = tpu.concatenate %75, %78 in 1 : vector<16x64xf32>, vector<16x64xf32> -> vector<16x128xf32>
      %80 = arith.truncf %79 : vector<16x128xf32> to vector<16x128xbf16>
      %c0_32 = arith.constant 0 : index
      %c0_33 = arith.constant 0 : index
      %81 = vector.load %arg7[%c0_32, %c0_33] : memref<16x256xbf16, #tpu.memory_space<vmem>>, vector<16x128xbf16>
      tpu.vector_store %arg7[%c0_32, %c0_33], %80 {strides = array<i32>} : memref<16x256xbf16, #tpu.memory_space<vmem>>, vector<16x128xbf16>,
      %c0_34 = arith.constant 0 : index
      %c640 = arith.constant 640 : index
      %82 = vector.load %arg9[%c0_34, %c640] : memref<16x1024xf32, #tpu.memory_space<vmem>>, vector<16x128xf32>
      %83 = vector.extract_strided_slice %82 {offsets = [0, 0], sizes = [16, 64], strides = [1, 1]} : vector<16x128xf32> to vector<16x64xf32>
      %84 = vector.extract_strided_slice %82 {offsets = [0, 64], sizes = [16, 64], strides = [1, 1]} : vector<16x128xf32> to vector<16x64xf32>
      %85 = arith.mulf %83, %12 : vector<16x64xf32>
      %86 = arith.mulf %84, %13 : vector<16x64xf32>
      %87 = arith.subf %85, %86 : vector<16x64xf32>
      %88 = arith.mulf %84, %12 : vector<16x64xf32>
      %89 = arith.mulf %83, %13 : vector<16x64xf32>
      %90 = arith.addf %88, %89 : vector<16x64xf32>
      %91 = tpu.concatenate %87, %90 in 1 : vector<16x64xf32>, vector<16x64xf32> -> vector<16x128xf32>
      %92 = arith.truncf %91 : vector<16x128xf32> to vector<16x128xbf16>
      %c0_35 = arith.constant 0 : index
      %c128_36 = arith.constant 128 : index
      %93 = vector.load %arg7[%c0_35, %c128_36] : memref<16x256xbf16, #tpu.memory_space<vmem>>, vector<16x128xbf16>
      tpu.vector_store %arg7[%c0_35, %c128_36], %92 {strides = array<i32>} : memref<16x256xbf16, #tpu.memory_space<vmem>>, vector<16x128xbf16>,
      %c0_37 = arith.constant 0 : index
      %c768 = arith.constant 768 : index
      %94 = vector.load %arg9[%c0_37, %c768] : memref<16x1024xf32, #tpu.memory_space<vmem>>, vector<16x256xf32>
      %95 = arith.truncf %94 : vector<16x256xf32> to vector<16x256xbf16>
      %c0_38 = arith.constant 0 : index
      %c0_39 = arith.constant 0 : index
      %96 = vector.load %arg8[%c0_38, %c0_39] : memref<16x256xbf16, #tpu.memory_space<vmem>>, vector<16x256xbf16>
      tpu.vector_store %arg8[%c0_38, %c0_39], %95 {strides = array<i32>} : memref<16x256xbf16, #tpu.memory_space<vmem>>, vector<16x256xbf16>,
    } else {
    }
    return
  }
  func.func @transform_0(%arg0: i32, %arg1: i32) -> (i32, i32) {
    %c0_i32 = arith.constant 0 : i32
    return %arg0, %arg1 : i32, i32
  }
  func.func @transform_1(%arg0: i32, %arg1: i32) -> (i32, i32) {
    %c0_i32 = arith.constant 0 : i32
    %c0_i32_0 = arith.constant 0 : i32
    return %arg1, %c0_i32 : i32, i32
  }
  func.func @transform_2(%arg0: i32, %arg1: i32) -> (i32, i32) {
    %c1_i32 = arith.constant 1 : i32
    %c0_i32 = arith.constant 0 : i32
    %0 = arith.cmpi eq, %c1_i32, %c0_i32 : i32
    %c1_i32_0 = arith.constant 1 : i32
    %1 = arith.select %0, %c1_i32_0, %c1_i32 : i32
    %2 = arith.remsi %arg0, %1 : i32
    %c0_i32_1 = arith.constant 0 : i32
    %3 = arith.cmpi ne, %2, %c0_i32_1 : i32
    %c0_i32_2 = arith.constant 0 : i32
    %4 = arith.cmpi slt, %2, %c0_i32_2 : i32
    %c0_i32_3 = arith.constant 0 : i32
    %5 = arith.cmpi slt, %1, %c0_i32_3 : i32
    %6 = arith.xori %4, %5 : i1
    %7 = arith.andi %6, %3 : i1
    %8 = arith.addi %2, %1 : i32
    %9 = arith.select %7, %8, %2 : i32
    %c0_i32_4 = arith.constant 0 : i32
    %c0_i32_5 = arith.constant 0 : i32
    return %9, %c0_i32_4 : i32, i32
  }
  func.func @transform_3(%arg0: i32, %arg1: i32) -> (i32, i32) {
    %c1_i32 = arith.constant 1 : i32
    %c0_i32 = arith.constant 0 : i32
    %0 = arith.cmpi eq, %c1_i32, %c0_i32 : i32
    %c1_i32_0 = arith.constant 1 : i32
    %1 = arith.select %0, %c1_i32_0, %c1_i32 : i32
    %2 = arith.remsi %arg0, %1 : i32
    %c0_i32_1 = arith.constant 0 : i32
    %3 = arith.cmpi ne, %2, %c0_i32_1 : i32
    %c0_i32_2 = arith.constant 0 : i32
    %4 = arith.cmpi slt, %2, %c0_i32_2 : i32
    %c0_i32_3 = arith.constant 0 : i32
    %5 = arith.cmpi slt, %1, %c0_i32_3 : i32
    %6 = arith.xori %4, %5 : i1
    %7 = arith.andi %6, %3 : i1
    %8 = arith.addi %2, %1 : i32
    %9 = arith.select %7, %8, %2 : i32
    %c0_i32_4 = arith.constant 0 : i32
    %c0_i32_5 = arith.constant 0 : i32
    return %9, %c0_i32_4 : i32, i32
  }
  func.func @transform_4(%arg0: i32, %arg1: i32) -> (i32, i32) {
    %c0_i32 = arith.constant 0 : i32
    %c0_i32_0 = arith.constant 0 : i32
    return %arg0, %c0_i32 : i32, i32
  }
  func.func @transform_5(%arg0: i32, %arg1: i32) -> (i32, i32) {
    %c0_i32 = arith.constant 0 : i32
    %c0_i32_0 = arith.constant 0 : i32
    return %arg0, %c0_i32 : i32, i32
  }
  func.func @transform_6(%arg0: i32, %arg1: i32) -> (i32, i32) {
    %c0_i32 = arith.constant 0 : i32
    %c0_i32_0 = arith.constant 0 : i32
    return %arg0, %c0_i32 : i32, i32
  }
}

</mosaic_0001>

<bundles_post_ra>
// kernel: tpu_custom_call.1
= control target key start
LH: loop header
LB: loop body
LE: loop exit
PB: predicated region body
PF: predicated region fallthrough
CT: control target
= control target key end

     0   :  { %s3523_s0 = inlined_call_operand.hbm [shape: bf16[32,256], index: 0, kind: input, shape index: {}]   ;;  %s3524_s1 = inlined_call_operand.hbm [shape: bf16[256,1024], index: 1, kind: input, shape index: {}]   ;;  %s3525_s2 = inlined_call_operand.hbm [shape: f32[16,64], index: 2, kind: input, shape index: {}]   ;;  %s3526_s3 = inlined_call_operand.hbm [shape: f32[16,64], index: 3, kind: input, shape index: {}]   ;;  %s3527_s4 = inlined_call_operand.hbm [shape: bf16[32,512], index: 4, kind: output, shape index: {0}]   ;;  %s3528_s5 = inlined_call_operand.hbm [shape: bf16[32,256], index: 5, kind: output, shape index: {1}]   ;;  %s3529_s6 = inlined_call_operand.hbm [shape: bf16[32,256], index: 6, kind: output, shape index: {2}]  }
   0x1   :  { %3534 = sst [smem:[#allocation21_spill]] %s3524_s1 }
   0x2   :  { %3535 = sst [smem:[#allocation22_spill]] %s3525_s2 }
   0x3   :  { %3536 = sst [smem:[#allocation23_spill]] %s3526_s3 }
   0x4   :  { %12 = vsyncpa [#allocation4], 0 }
   0x5   :  { %14 = vsyncpa [#allocation4 + $0x1], 0 }
   0x6   :  { %15 = vsyncpa [#allocation7], 0 }
   0x7   :  { %16 = vsyncpa [#allocation10], 0 }
   0x8   :  { %17 = vsyncpa [#allocation5], 0 }
   0x9   :  { %19 = vsyncpa [#allocation5 + $0x1], 0 }
   0xa   :  { %20 = vsyncpa [#allocation13], 0 }
   0xb   :  { %22 = vsyncpa [#allocation13 + $0x1], 0  ;;  %s3063_s21 = smov 0   ;;  %s3065_s22 = smov 0  }
   0xc   :  { %s3067_s23 = smov 0   ;;  %s3069_s24 = smov 0  }
   0xd   :  { %s3071_s25 = smov 0   ;;  %s3073_s26 = smov 0  }
   0xe LB: > { %s3094_s27 = sadd.s32 4294967295, %s3014_s26   ;;  %s3530_s28 = sadd.s32 4294967294, %s3014_s26   ;;  %s3014_s26 = sphi %s3073_s26, %s28_s26   ;;  %s3010_s25 = sphi %s3071_s25, %s3555_s25   ;;  %s3006_s24 = sphi %s3069_s24, %s3554_s24   ;;  %s3002_s23 = sphi %s3067_s23, %s3553_s23   ;;  %s2998_s22 = sphi %s3065_s22, %s3552_s22   ;;  %s2994_s21 = sphi %s3063_s21, %s3551_s21  }
   0xf   : > { %p62_p0 = scmp.ne.s32.totalorder %s2998_s22, %s2994_s21  ;;  %p63_p1 = scmp.eq.s32.totalorder %s3094_s27, 0 }
  0x10   : > { %p154_p2 = scmp.eq.s32.totalorder %s3094_s27, 1  ;;  %p160_p3 = scmp.eq.s32.totalorder %s3530_s28, 1 }
  0x11   : > { %p3105_p4 = por %p63_p1, %p62_p0  ;;  %p1943_p5 = scmp.ge.s32.totalorder %s3014_s26, 1 }
  0x12   : > { %p3110_p6 = por %p160_p3, %p62_p0  ;;  %p219_p7 = scmp.lt.s32.totalorder %s3014_s26, 3 }
  0x13   : > { %s3539_s1 = sld [smem:[#allocation21_spill]]  ;;  %s3016_s11 = smov [#allocation6]  }
  0x14   : > { %p3118_p8 = pnand %p1943_p5, %p219_p7  ;;  %s236_s12 = sshll.u32 %s3016_s11, 4  ;;  %s237_s12 = int_to_ptr.vmem [resolvable:$true] %s236_s12 }
  0x15   : > { %p1947_p11 = scmp.ge.s32.totalorder %s3014_s26, 2  ;;  %s3542_s2 = sld [smem:[#allocation22_spill]] }
  0x16   : > { %p2652_p9 = pneg %p3118_p8  ;;  %s3017_s17 = smov 512  }
  0x17   : > { %s3018_s18 = smov 32   ;;  %s3019_s19 = smov [#allocation8]  }
  0x18   : > { %p3126_p10 = pnand %p2652_p9, %p63_p1  ;;  %s250_s20 = sshll.u32 %s3019_s19, 4  ;;  %s251_s20 = int_to_ptr.vmem [resolvable:$true] %s250_s20 }
  0x19   : > { %s234_s9 = sshll.u32 %s3539_s1, 4  ;;  %s3531_s7 = smov 128   ;;  %s235_s9 = int_to_ptr.hbm [resolvable:$true] %s234_s9 }
  0x1a   : > { %2655 = dma.hbm_to_vmem [thread:$0]  (!%p3126_p10), %s235_s9, 16384, %s237_s12, [#allocation7], %s3017_s17, %s3017_s17, %s3018_s18  }
  0x1b   : > { %s248_s16 = sshll.u32 %s3542_s2, 4  ;;  %s3532_s8 = smov 8   ;;  %s249_s16 = int_to_ptr.hbm [resolvable:$true] %s248_s16 }
  0x1c   : > { %2658 = dma.hbm_to_vmem [thread:$0]  (!%p3126_p10), %s249_s16, 256, %s251_s20, [#allocation7], %s3531_s7, %s3531_s7, %s3532_s8  }
  0x1d   : > { %s3543_s3 = sld [smem:[#allocation23_spill]]  ;;  %s3022_s9 = smov [#allocation9]  }
  0x1e   : > { %s264_s12 = sshll.u32 %s3022_s9, 4  ;;  %s49_s17 = sadd.s32 1, %s3002_s23  ;;  %s265_s12 = int_to_ptr.vmem [resolvable:$true] %s264_s12 }
  0x1f   : > { %s40_s18 = sadd.s32 1, %s3010_s25  ;;  %p56_p12 = scmp.ne.s32.totalorder %s3002_s23, %s2998_s22 }
  0x20   : > { %p42_p13 = scmp.ge.s32.totalorder %s40_s18, 2  ;;  %p57_p0 = scmp.eq.s32.totalorder %s3014_s26, 0 }
  0x21   : > { %p3156_p3 = por %p154_p2, %p56_p12  ;;  %p2679_p5 = scmp.lt.s32.totalorder %s3014_s26, 2 }
  0x22   : > { %s3557_s18 = smov (%p42_p13, %s40_s18), 0  ;;  %p3163_p7 = por %p57_p0, %p56_p12 }
  0x23   : > { %s262_s15 = sshll.u32 %s3543_s3, 4  ;;  %3545 = sst [smem:[#allocation20_spill]] %s3557_s18  ;;  %s263_s15 = int_to_ptr.hbm [resolvable:$true] %s262_s15 }
  0x24   : > { %2661 = dma.hbm_to_vmem [thread:$0]  (!%p3126_p10), %s263_s15, 256, %s265_s12, [#allocation10], %s3531_s7, %s3531_s7, %s3532_s8  }
  0x25   : > { %s278_s19 = sand.u32 1, %s3002_s23   ;;  %s44_s20 = ssub.s32 %s3010_s25, %s3557_s18 }
  0x26   : > { %p47_p9 = scmp.eq.s32.totalorder %s44_s20, 0  ;;  %s1948_s11 = sshll.u32 %s278_s19, 4 }
  0x27   : > { %s2495_s14 = sshll.u32 %s3010_s25, 4  ;;  %s282_s7 = scalar_lea.vmem [#allocation3], %s1948_s11 }
  0x28   : > { %s3172_s15 = scalar_select %p47_p9, %s3002_s23, %s49_s17  }
  0x29   : > { %s290_s28 = scalar_lea.hbm %s3523_s0, %s2495_s14  ;;  %s293_s8 = sshll.u32 %s282_s7, 4  ;;  %s294_s8 = int_to_ptr.vmem [resolvable:$true] %s293_s8 }
  0x2a   : > { %s291_s1 = sshll.u32 %s290_s28, 4  ;;  %p2663_p2 = pnand %p2679_p5, %p3163_p7  ;;  %s292_s1 = int_to_ptr.hbm [resolvable:$true] %s291_s1 }
  0x2b   : > { %s279_s2 = scalar_lea.sflag [#allocation4], %s278_s19  ;;  %s3547_s3 = smov 8  }
  0x2c   : > { %s3548_s18 = smov 128   ;;  %305 = sbr.rel (%p3118_p8) target bundleno = 443 (0x1bb), region = 36 }
  0x2d   : > { %2665 = dma.hbm_to_vmem [thread:$0]  (!%p2663_p2), %s292_s1, 256, %s294_s8, %s279_s2, %s3548_s18, %s3548_s18, %s3547_s3  }
  0x2e   : > { %s3187_s17 = sand.u32 (!%p3118_p8), 1, %s2998_s22  }
  0x2f   : > { %s3190_s28 = sshll.u32 (!%p3118_p8), %s3187_s17, 4  ;;  %s308_s7 = scalar_lea.sflag (!%p3118_p8), [#allocation4], %s3187_s17 }
  0x30   : > { %s3194_s13 = scalar_lea.vmem (!%p3118_p8), [#allocation3], %s3190_s28 }
  0x31   : > { %2973 = dma.done.wait (%p3105_p4), %s308_s7, 256  }
  0x32   : > { %2975 = vsyncadd (%p3105_p4), %s308_s7, 4294967040 }
  0x33   : > { %2977 = dma.done.wait (%p63_p1), [#allocation7], 16640  }
  0x34   : > { %2979 = vsyncadd (%p63_p1), [#allocation7], 4294950656 }
  0x35   : > { %2981 = dma.done.wait (%p63_p1), [#allocation10], 256  }
  0x36   : > { %2983 = vsyncadd (%p63_p1), [#allocation10], 4294967040  ;;  %v2194_v0 = vld [vmem:[#allocation6 + $0x1c0] sm:$0xf]  ;;  %v2554_v5 = vld [vmem:[#allocation6 + $0x1c4] sm:$0xf] }
  0x37   : > { %v2558_v1 = vld [vmem:[#allocation6 + $0x1dc] sm:$0xf0]  ;;  %v2196_v6 = vld [vmem:[#allocation6 + $0x1e0] sm:$0xf0]  ;;  %s3023_s1 = smov 64   ;;  %vm1497_vm0 = vcmask 523264  }
  0x38   : > { %v2450_v2 = vld [vmem:[#allocation6 + $0x3c0] sm:$0xf]  ;;  %v2195_v3 = vor.u32 %v2558_v1, %v2194_v0  ;;  %v2199_v8 = vor.u32 %v2554_v5, %v2196_v6  ;;  %v2618_v9 = vld [vmem:[#allocation6 + $0x3c4] sm:$0xf]  ;;  %s1957_s2 = sshll.u32 %s3187_s17, 5  ;;  %s3393_s29 = scalar_lea.vmem [#allocation14], %s3190_s28 }
  0x39   : > { %v2622_v4 = vld [vmem:[#allocation6 + $0x3dc] sm:$0xf0]  ;;  %v2452_v10 = vld [vmem:[#allocation6 + $0x3e0] sm:$0xf0]  ;;  %s3362_s3 = scalar_lea.vmem [#allocation11], %s1957_s2  ;;  %s2627_s10 = sshll.u32 %s3006_s24, 5 }
  0x3a   : > { %v2451_v7 = vor.u32 %v2622_v4, %v2450_v2  ;;  %v2162_v11 = vld [vmem:[#allocation6 + $0x180] sm:$0xf]  ;;  %1188 = vmatpush.bf16.msra.mxu0 %v2195_v3  ;;  %v2455_v12 = vor.u32 %v2618_v9, %v2452_v10  ;;  %1216 = vmatpush.bf16.msra.mxu2 %v2199_v8  ;;  %v2546_v18 = vld [vmem:[#allocation6 + $0x184] sm:$0xf]  ;;  %s1723_s19 = scalar_lea.hbm %s3527_s4, %s2627_s10  ;;  %s1724_s20 = sshll.u32 %s3362_s3, 4  ;;  %s1725_s20 = int_to_ptr.vmem [resolvable:$true] %s1724_s20 }
  0x3b   : > { %v2550_v13 = vld [vmem:[#allocation6 + $0x19c] sm:$0xf0]  ;;  %v2164_v19 = vld [vmem:[#allocation6 + $0x1a0] sm:$0xf0]  ;;  %s1726_s11 = sshll.u32 %s1723_s19, 4  ;;  %s1701_s14 = scalar_lea.sflag [#allocation5], %s3187_s17  ;;  %s1727_s11 = int_to_ptr.hbm [resolvable:$true] %s1726_s11 }
  0x3c   : > { %v2418_v14 = vld [vmem:[#allocation6 + $0x380] sm:$0xf]  ;;  %1202 = vmatpush.bf16.msra.mxu1 %v2451_v7  ;;  %v2163_v16 = vor.u32 %v2550_v13, %v2162_v11  ;;  %v2610_v20 = vld [vmem:[#allocation6 + $0x384] sm:$0xf]  ;;  %1230 = vmatpush.bf16.msra.mxu3 %v2455_v12  ;;  %v2167_v21 = vor.u32 %v2546_v18, %v2164_v19  ;;  %s2878_s9 = sshra.s32 %s1727_s11, 4  ;;  %s2879_s9 = int_to_ptr.hbm [resolvable:$true] %s2878_s9 }
  0x3d   : > { %v2614_v15 = vld [vmem:[#allocation6 + $0x39c] sm:$0xf0]  ;;  %v2420_v22 = vld [vmem:[#allocation6 + $0x3a0] sm:$0xf0]  ;;  %s2880_s12 = scalar_lea.hbm %s2879_s9, 32  ;;  %p2885_p10 = scmp.lt.s32.totalorder %s2879_s9, %s3527_s4 }
  0x3e   : > { %v2419_v17 = vor.u32 %v2614_v15, %v2418_v14  ;;  %v2130_v23 = vld [vmem:[#allocation6 + $0x140] sm:$0xf]  ;;  %v2423_v25 = vor.u32 %v2610_v20, %v2420_v22  ;;  %v2538_v28 = vld [vmem:[#allocation6 + $0x144] sm:$0xf]  ;;  %1189 = vmatpush.bf16.msra.mxu0 %v2163_v16  ;;  %1217 = vmatpush.bf16.msra.mxu2 %v2167_v21  ;;  %p2881_p1 = scmp.ne.s32.totalorder %s2879_s9, %s2880_s12 }
  0x3f   : > { %v2542_v24 = vld [vmem:[#allocation6 + $0x15c] sm:$0xf0]  ;;  %v2132_v30 = vld [vmem:[#allocation6 + $0x160] sm:$0xf0] }
  0x40   : > { %v2386_v26 = vld [vmem:[#allocation6 + $0x340] sm:$0xf]  ;;  %v2131_v29 = vor.u32 %v2542_v24, %v2130_v23  ;;  %v2602_v31 = vld [vmem:[#allocation6 + $0x344] sm:$0xf]  ;;  %1203 = vmatpush.bf16.msra.mxu1 %v2419_v17  ;;  %v2135_v34 = vor.u32 %v2538_v28, %v2132_v30  ;;  %1231 = vmatpush.bf16.msra.mxu3 %v2423_v25  ;;  %v2202_v28 = vld [vmem:[#allocation6 + $0x1c8] sm:$0xf]  ;;  %p2882_p4 = pnand %p2881_p1, %p3156_p3 }
  0x41   : > { %v2606_v27 = vld [vmem:[#allocation6 + $0x35c] sm:$0xf0]  ;;  %v2388_v32 = vld [vmem:[#allocation6 + $0x360] sm:$0xf0]  ;;  %v2458_v30 = vld [vmem:[#allocation6 + $0x3c8] sm:$0xf] }
  0x42   : > { %v2387_v33 = vor.u32 %v2606_v27, %v2386_v26  ;;  %v2098_v35 = vld [vmem:[#allocation6 + $0x100] sm:$0xf]  ;;  %v2391_v38 = vor.u32 %v2602_v31, %v2388_v32  ;;  %v2530_v40 = vld [vmem:[#allocation6 + $0x104] sm:$0xf]  ;;  %1190 = vmatpush.bf16.msra.mxu0 %v2131_v29  ;;  %1218 = vmatpush.bf16.msra.mxu2 %v2135_v34  ;;  %v2559_v29 = vld [vmem:[#allocation6 + $0x1e4] sm:$0xf0]  ;;  %p2883_p8 = pneg %p2882_p4 }
  0x43   : > { %v2534_v36 = vld [vmem:[#allocation6 + $0x11c] sm:$0xf0]  ;;  %v2100_v41 = vld [vmem:[#allocation6 + $0x120] sm:$0xf0]  ;;  %v2623_v31 = vld [vmem:[#allocation6 + $0x3e4] sm:$0xf0] }
  0x44   : > { %v2354_v37 = vld [vmem:[#allocation6 + $0x300] sm:$0xf]  ;;  %v2594_v42 = vld [vmem:[#allocation6 + $0x304] sm:$0xf]  ;;  %v2099_v44 = vor.u32 %v2534_v36, %v2098_v35  ;;  %1204 = vmatpush.bf16.msra.mxu1 %v2387_v33  ;;  %v2103_v46 = vor.u32 %v2530_v40, %v2100_v41  ;;  %1232 = vmatpush.bf16.msra.mxu3 %v2391_v38  ;;  %v2555_v33 = vld [vmem:[#allocation6 + $0x1cc] sm:$0xf] }
  0x45   : > { %v2598_v39 = vld [vmem:[#allocation6 + $0x31c] sm:$0xf0]  ;;  %v2356_v43 = vld [vmem:[#allocation6 + $0x320] sm:$0xf0]  ;;  %v2204_v34 = vld [vmem:[#allocation6 + $0x1e8] sm:$0xf0] }
  0x46   : > { %v2355_v45 = vor.u32 %v2598_v39, %v2354_v37  ;;  %v2066_v47 = vld [vmem:[#allocation6 + $0xc0] sm:$0xf]  ;;  %v2359_v50 = vor.u32 %v2594_v42, %v2356_v43  ;;  %v2522_v52 = vld [vmem:[#allocation6 + $0xc4] sm:$0xf]  ;;  %1191 = vmatpush.bf16.msra.mxu0 %v2099_v44  ;;  %1219 = vmatpush.bf16.msra.mxu2 %v2103_v46  ;;  %v2619_v35 = vld [vmem:[#allocation6 + $0x3cc] sm:$0xf]  ;;  %v2203_v42 = vor.u32 %v2559_v29, %v2202_v28 }
  0x47   : > { %v2526_v48 = vld [vmem:[#allocation6 + $0xdc] sm:$0xf0]  ;;  %v2068_v53 = vld [vmem:[#allocation6 + $0xe0] sm:$0xf0]  ;;  %v2460_v38 = vld [vmem:[#allocation6 + $0x3e8] sm:$0xf0]  ;;  %v2207_v46 = vor.u32 %v2555_v33, %v2204_v34 }
  0x48   : > { %v2322_v49 = vld [vmem:[#allocation6 + $0x2c0] sm:$0xf]  ;;  %v2586_v54 = vld [vmem:[#allocation6 + $0x2c4] sm:$0xf]  ;;  %v2067_v56 = vor.u32 %v2526_v48, %v2066_v47  ;;  %1205 = vmatpush.bf16.msra.mxu1 %v2355_v45  ;;  %v2071_v58 = vor.u32 %v2522_v52, %v2068_v53  ;;  %1233 = vmatpush.bf16.msra.mxu3 %v2359_v50  ;;  %v2497_v40 = vld [vmem:[%s3194_s13 + $0x4] sm:$0xf0]  ;;  %v2459_v45 = vor.u32 %v2623_v31, %v2458_v30 }
  0x49   : > { %v2590_v51 = vld [vmem:[#allocation6 + $0x2dc] sm:$0xf0]  ;;  %v2324_v55 = vld [vmem:[#allocation6 + $0x2e0] sm:$0xf0]  ;;  %v1964_v44 = vld [vmem:[%s3194_s13 + $0x8] sm:$0xf0]  ;;  %v2463_v50 = vor.u32 %v2619_v35, %v2460_v38 }
  0x4a   : > { %v2323_v57 = vor.u32 %v2590_v51, %v2322_v49  ;;  %v2034_v59 = vld [vmem:[#allocation6 + $0x80] sm:$0xf]  ;;  %v2327_v62 = vor.u32 %v2586_v54, %v2324_v55  ;;  %v2514_v0 = vld [vmem:[#allocation6 + $0x84] sm:$0xf]  ;;  %1192 = vmatpush.bf16.msra.mxu0 %v2067_v56  ;;  %1220 = vmatpush.bf16.msra.mxu2 %v2071_v58  ;;  %v2170_v47 = vld [vmem:[#allocation6 + $0x188] sm:$0xf] }
  0x4b   : > { %v2518_v60 = vld [vmem:[#allocation6 + $0x9c] sm:$0xf0]  ;;  %v2036_v1 = vld [vmem:[#allocation6 + $0xa0] sm:$0xf0]  ;;  %v2551_v48 = vld [vmem:[#allocation6 + $0x1a4] sm:$0xf0] }
  0x4c   : > { %v2290_v61 = vld [vmem:[#allocation6 + $0x280] sm:$0xf]  ;;  %v2578_v2 = vld [vmem:[#allocation6 + $0x284] sm:$0xf]  ;;  %v2035_v4 = vor.u32 %v2518_v60, %v2034_v59  ;;  %1206 = vmatpush.bf16.msra.mxu1 %v2323_v57  ;;  %v2039_v6 = vor.u32 %v2514_v0, %v2036_v1  ;;  %1234 = vmatpush.bf16.msra.mxu3 %v2327_v62  ;;  %v2426_v49 = vld [vmem:[#allocation6 + $0x388] sm:$0xf]  ;;  %v2171_v58 = vor.u32 %v2551_v48, %v2170_v47 }
  0x4d   : > { %v2582_v63 = vld [vmem:[#allocation6 + $0x29c] sm:$0xf0]  ;;  %v2292_v3 = vld [vmem:[#allocation6 + $0x2a0] sm:$0xf0]  ;;  %v2615_v52 = vld [vmem:[#allocation6 + $0x3a4] sm:$0xf0] }
  0x4e   : > { %v2291_v5 = vor.u32 %v2582_v63, %v2290_v61  ;;  %v2002_v7 = vld [vmem:[#allocation6 + $0x40] sm:$0xf]  ;;  %v2295_v10 = vor.u32 %v2578_v2, %v2292_v3  ;;  %v2506_v12 = vld [vmem:[#allocation6 + $0x44] sm:$0xf]  ;;  %1193 = vmatpush.bf16.msra.mxu0 %v2035_v4  ;;  %1221 = vmatpush.bf16.msra.mxu2 %v2039_v6  ;;  %v2547_v53 = vld [vmem:[#allocation6 + $0x18c] sm:$0xf]  ;;  %v2427_v59 = vor.u32 %v2615_v52, %v2426_v49 }
  0x4f   : > { %v2510_v8 = vld [vmem:[#allocation6 + $0x5c] sm:$0xf0]  ;;  %v2004_v13 = vld [vmem:[#allocation6 + $0x60] sm:$0xf0]  ;;  %v2172_v54 = vld [vmem:[#allocation6 + $0x1a8] sm:$0xf0] }
  0x50   : > { %v2258_v9 = vld [vmem:[#allocation6 + $0x240] sm:$0xf]  ;;  %v2570_v14 = vld [vmem:[#allocation6 + $0x244] sm:$0xf]  ;;  %v2003_v16 = vor.u32 %v2510_v8, %v2002_v7  ;;  %1207 = vmatpush.bf16.msra.mxu1 %v2291_v5  ;;  %v2007_v21 = vor.u32 %v2506_v12, %v2004_v13  ;;  %1235 = vmatpush.bf16.msra.mxu3 %v2295_v10  ;;  %v2611_v56 = vld [vmem:[#allocation6 + $0x38c] sm:$0xf]  ;;  %v2175_v60 = vor.u32 %v2547_v53, %v2172_v54 }
  0x51   : > { %v2574_v11 = vld [vmem:[#allocation6 + $0x25c] sm:$0xf0]  ;;  %v2260_v15 = vld [vmem:[#allocation6 + $0x260] sm:$0xf0]  ;;  %v2428_v57 = vld [vmem:[#allocation6 + $0x3a8] sm:$0xf0] }
  0x52   : > { %v1970_v17 = vld [vmem:[#allocation6] sm:$0xf]  ;;  %v2259_v20 = vor.u32 %v2574_v11, %v2258_v9  ;;  %v2498_v23 = vld [vmem:[#allocation6 + $0x4] sm:$0xf]  ;;  %v2263_v25 = vor.u32 %v2570_v14, %v2260_v15  ;;  %1194 = vmatpush.bf16.msra.mxu0 %v2003_v16  ;;  %1222 = vmatpush.bf16.msra.mxu2 %v2007_v21  ;;  %v2138_v61 = vld [vmem:[#allocation6 + $0x148] sm:$0xf]  ;;  %v2431_v0 = vor.u32 %v2611_v56, %v2428_v57 }
  0x53   : > { %v2502_v18 = vld [vmem:[#allocation6 + $0x1c] sm:$0xf0]  ;;  %v1972_v24 = vld [vmem:[#allocation6 + $0x20] sm:$0xf0]  ;;  %v2543_v62 = vld [vmem:[#allocation6 + $0x164] sm:$0xf0] }
  0x54   : > { %v2226_v19 = vld [vmem:[#allocation6 + $0x200] sm:$0xf]  ;;  %v2562_v26 = vld [vmem:[#allocation6 + $0x204] sm:$0xf]  ;;  %v1971_v32 = vor.u32 %v2502_v18, %v1970_v17  ;;  %1208 = vmatpush.bf16.msra.mxu1 %v2259_v20  ;;  %v1975_v37 = vor.u32 %v2498_v23, %v1972_v24  ;;  %1236 = vmatpush.bf16.msra.mxu3 %v2263_v25  ;;  %v2394_v63 = vld [vmem:[#allocation6 + $0x348] sm:$0xf]  ;;  %v2139_v7 = vor.u32 %v2543_v62, %v2138_v61 }
  0x55   : > { %v2566_v22 = vld [vmem:[#allocation6 + $0x21c] sm:$0xf0]  ;;  %v2228_v27 = vld [vmem:[#allocation6 + $0x220] sm:$0xf0]  ;;  %v2607_v1 = vld [vmem:[#allocation6 + $0x364] sm:$0xf0] }
  0x56   : > { %v2227_v36 = vor.u32 %v2566_v22, %v2226_v19  ;;  %v1962_v39 = vld [vmem:[%s3194_s13] sm:$0xf]  ;;  %v2231_v41 = vor.u32 %v2562_v26, %v2228_v27  ;;  %v2496_v43 = vld [vmem:[%s3194_s13 + $0x4] sm:$0xf]  ;;  %1195 = vmatpush.bf16.msra.mxu0 %v1971_v32  ;;  %1223 = vmatpush.bf16.msra.mxu2 %v1975_v37  ;;  %v2539_v2 = vld [vmem:[#allocation6 + $0x14c] sm:$0xf]  ;;  %v2395_v8 = vor.u32 %v2607_v1, %v2394_v63 }
  0x57   : > { %v3212_v51 = vor.u32 %v2497_v40, %v1962_v39  ;;  %v3214_v55 = vor.u32 %v2496_v43, %v1964_v44  ;;  %v2140_v3 = vld [vmem:[#allocation6 + $0x168] sm:$0xf0]  ;;  %v3219_v6 = vld [vmem:[#allocation9] sm:$0xff]  ;;  %v2106_v10 = vld [vmem:[#allocation6 + $0x108] sm:$0xf] }
  0x58   : > { %1209 = vmatpush.bf16.msra.mxu1 %v2227_v36  ;;  %1237 = vmatpush.bf16.msra.mxu3 %v2231_v41  ;;  %v2603_v4 = vld [vmem:[#allocation6 + $0x34c] sm:$0xf]  ;;  %v2143_v9 = vor.u32 %v2539_v2, %v2140_v3  ;;  %v2535_v11 = vld [vmem:[#allocation6 + $0x124] sm:$0xf0]  ;;  %v3224_v31 = vld [vmem:[#allocation9 + $0x8] sm:$0xff] }
  0x59   : > { %1196 = vmatmul.bf16.vlgmr.msra.gmra.mxu0 %v3212_v51  ;;  %1224 = vmatmul.bf16.vlgmr.msra.gmra.mxu2 %v3212_v51  ;;  %v2396_v5 = vld [vmem:[#allocation6 + $0x368] sm:$0xf0]  ;;  %v2362_v12 = vld [vmem:[#allocation6 + $0x308] sm:$0xf]  ;;  %v2107_v19 = vor.u32 %v2535_v11, %v2106_v10  ;;  %v2624_v11 = vld [vmem:[#allocation6 + $0x3ec] sm:$0xf0] }
  0x5a   : > { %1244 = vmatpush.bf16.msrb.mxu0 %v2203_v42  ;;  %1272 = vmatpush.bf16.msrb.mxu2 %v2207_v46  ;;  %v2399_v13 = vor.u32 %v2603_v4, %v2396_v5  ;;  %v2599_v14 = vld [vmem:[#allocation6 + $0x324] sm:$0xf0]  ;;  %v2531_v15 = vld [vmem:[#allocation6 + $0x10c] sm:$0xf] }
  0x5b   : > { %1210 = vmatmul.bf16.vlgmr.msra.gmra.mxu1 %v3214_v55  ;;  %1238 = vmatmul.bf16.vlgmr.msra.gmra.mxu3 %v3214_v55  ;;  %v2108_v16 = vld [vmem:[#allocation6 + $0x128] sm:$0xf0]  ;;  %v2363_v20 = vor.u32 %v2599_v14, %v2362_v12  ;;  %v2074_v22 = vld [vmem:[#allocation6 + $0xc8] sm:$0xf]  ;;  %v2556_v12 = vld [vmem:[#allocation6 + $0x1d4] sm:$0xf] }
  0x5c   : > { %1258 = vmatpush.bf16.msrb.mxu1 %v2459_v45  ;;  %1286 = vmatpush.bf16.msrb.mxu3 %v2463_v50  ;;  %v2595_v17 = vld [vmem:[#allocation6 + $0x30c] sm:$0xf]  ;;  %v2111_v21 = vor.u32 %v2531_v15, %v2108_v16  ;;  %v2527_v23 = vld [vmem:[#allocation6 + $0xe4] sm:$0xf0]  ;;  %v2620_v16 = vld [vmem:[#allocation6 + $0x3d4] sm:$0xf] }
  0x5d   : > { %1457 = vrot.lane.b32.xlu0 %v3219_v6, %s3023_s1  ;;  %v2364_v18 = vld [vmem:[#allocation6 + $0x328] sm:$0xf0]  ;;  %v2330_v24 = vld [vmem:[#allocation6 + $0x2c8] sm:$0xf]  ;;  %v2075_v32 = vor.u32 %v2527_v23, %v2074_v22  ;;  %v2178_v23 = vld [vmem:[#allocation6 + $0x190] sm:$0xf] }
  0x5e   : > { %1245 = vmatpush.bf16.msrb.mxu0 %v2171_v58  ;;  %1273 = vmatpush.bf16.msrb.mxu2 %v2175_v60  ;;  %v2367_v25 = vor.u32 %v2595_v17, %v2364_v18  ;;  %v2591_v26 = vld [vmem:[#allocation6 + $0x2e4] sm:$0xf0]  ;;  %v2523_v27 = vld [vmem:[#allocation6 + $0xcc] sm:$0xf]  ;;  %v2468_v17 = vld [vmem:[#allocation6 + $0x3f0] sm:$0xf0] }
  0x5f   : > { %v2076_v28 = vld [vmem:[#allocation6 + $0xe8] sm:$0xf0]  ;;  %v2331_v33 = vor.u32 %v2591_v26, %v2330_v24  ;;  %v2042_v35 = vld [vmem:[#allocation6 + $0x88] sm:$0xf]  ;;  %v3228_v18 = vld [vmem:[#allocation8] sm:$0xff]  ;;  %v2471_v26 = vor.u32 %v2620_v16, %v2468_v17 }
  0x60   : > { %1259 = vmatpush.bf16.msrb.mxu1 %v2427_v59  ;;  %1287 = vmatpush.bf16.msrb.mxu3 %v2431_v0  ;;  %v2587_v29 = vld [vmem:[#allocation6 + $0x2cc] sm:$0xf]  ;;  %v2079_v34 = vor.u32 %v2523_v27, %v2076_v28  ;;  %v2519_v36 = vld [vmem:[#allocation6 + $0xa4] sm:$0xf0]  ;;  %v2552_v24 = vld [vmem:[#allocation6 + $0x1ac] sm:$0xf0] }
  0x61   : > { %v2332_v30 = vld [vmem:[#allocation6 + $0x2e8] sm:$0xf0]  ;;  %v2298_v37 = vld [vmem:[#allocation6 + $0x288] sm:$0xf]  ;;  %v2043_v44 = vor.u32 %v2519_v36, %v2042_v35  ;;  %1477 = vrot.lane.b32.xlu2 %v3228_v18, %s3023_s1  ;;  %v2616_v27 = vld [vmem:[#allocation6 + $0x3ac] sm:$0xf0] }
  0x62   : > { %1246 = vmatpush.bf16.msrb.mxu0 %v2139_v7  ;;  %1274 = vmatpush.bf16.msrb.mxu2 %v2143_v9  ;;  %v2335_v38 = vor.u32 %v2587_v29, %v2332_v30  ;;  %v2583_v39 = vld [vmem:[#allocation6 + $0x2a4] sm:$0xf0]  ;;  %v2515_v40 = vld [vmem:[#allocation6 + $0x8c] sm:$0xf]  ;;  %v2210_v7 = vld [vmem:[#allocation6 + $0x1d0] sm:$0xf] }
  0x63   : > { %v2044_v41 = vld [vmem:[#allocation6 + $0xa8] sm:$0xf0]  ;;  %v2299_v45 = vor.u32 %v2583_v39, %v2298_v37  ;;  %v2010_v47 = vld [vmem:[#allocation6 + $0x48] sm:$0xf]  ;;  %v2466_v9 = vld [vmem:[#allocation6 + $0x3d0] sm:$0xf] }
  0x64   : > { %1260 = vmatpush.bf16.msrb.mxu1 %v2395_v8  ;;  %1288 = vmatpush.bf16.msrb.mxu3 %v2399_v13  ;;  %v2579_v42 = vld [vmem:[#allocation6 + $0x28c] sm:$0xf]  ;;  %v2047_v46 = vor.u32 %v2515_v40, %v2044_v41  ;;  %v2511_v48 = vld [vmem:[#allocation6 + $0x64] sm:$0xf0]  ;;  %v2560_v8 = vld [vmem:[#allocation6 + $0x1ec] sm:$0xf0] }
  0x65   : > { %1459 = vrot.lane.b32.xlu0 %v3224_v31, %s3023_s1  ;;  %v2300_v43 = vld [vmem:[#allocation6 + $0x2a8] sm:$0xf0]  ;;  %v2266_v49 = vld [vmem:[#allocation6 + $0x248] sm:$0xf]  ;;  %v2011_v58 = vor.u32 %v2511_v48, %v2010_v47  ;;  %v2212_v13 = vld [vmem:[#allocation6 + $0x1f0] sm:$0xf0] }
  0x66   : > { %1247 = vmatpush.bf16.msrb.mxu0 %v2107_v19  ;;  %1275 = vmatpush.bf16.msrb.mxu2 %v2111_v21  ;;  %v2303_v50 = vor.u32 %v2579_v42, %v2300_v43  ;;  %v2575_v52 = vld [vmem:[#allocation6 + $0x264] sm:$0xf0]  ;;  %v2507_v53 = vld [vmem:[#allocation6 + $0x4c] sm:$0xf]  ;;  %v2467_v21 = vor.u32 %v2624_v11, %v2466_v9  ;;  %v2215_v22 = vor.u32 %v2556_v12, %v2212_v13  ;;  %v2548_v28 = vld [vmem:[#allocation6 + $0x194] sm:$0xf] }
  0x67   : > { %v2012_v54 = vld [vmem:[#allocation6 + $0x68] sm:$0xf0]  ;;  %v1978_v59 = vld [vmem:[#allocation6 + $0x8] sm:$0xf]  ;;  %v2267_v61 = vor.u32 %v2575_v52, %v2266_v49  ;;  %v2180_v29 = vld [vmem:[#allocation6 + $0x1b0] sm:$0xf0] }
  0x68   : > { %1261 = vmatpush.bf16.msrb.mxu1 %v2363_v20  ;;  %1289 = vmatpush.bf16.msrb.mxu3 %v2367_v25  ;;  %v2571_v56 = vld [vmem:[#allocation6 + $0x24c] sm:$0xf]  ;;  %v2503_v60 = vld [vmem:[#allocation6 + $0x24] sm:$0xf0]  ;;  %v2015_v62 = vor.u32 %v2507_v53, %v2012_v54  ;;  %v2211_v20 = vor.u32 %v2560_v8, %v2210_v7  ;;  %v2434_v25 = vld [vmem:[#allocation6 + $0x390] sm:$0xf]  ;;  %v2183_v35 = vor.u32 %v2548_v28, %v2180_v29 }
  0x69   : > { %v2268_v57 = vld [vmem:[#allocation6 + $0x268] sm:$0xf0]  ;;  %v2234_v63 = vld [vmem:[#allocation6 + $0x208] sm:$0xf]  ;;  %v1979_v10 = vor.u32 %v2503_v60, %v1978_v59  ;;  %v2612_v30 = vld [vmem:[#allocation6 + $0x394] sm:$0xf] }
  0x6a   : > { %1248 = vmatpush.bf16.msrb.mxu0 %v2075_v32  ;;  %1276 = vmatpush.bf16.msrb.mxu2 %v2079_v34  ;;  %v2567_v0 = vld [vmem:[#allocation6 + $0x224] sm:$0xf0]  ;;  %v2499_v1 = vld [vmem:[#allocation6 + $0xc] sm:$0xf]  ;;  %v2271_v2 = vor.u32 %v2571_v56, %v2268_v57  ;;  %v2436_v32 = vld [vmem:[#allocation6 + $0x3b0] sm:$0xf0]  ;;  %v2435_v34 = vor.u32 %v2616_v27, %v2434_v25 }
  0x6b   : > { %v1980_v3 = vld [vmem:[#allocation6 + $0x28] sm:$0xf0]  ;;  %v2235_v14 = vor.u32 %v2567_v0, %v2234_v63  ;;  %v2146_v36 = vld [vmem:[#allocation6 + $0x150] sm:$0xf]  ;;  %v2439_v39 = vor.u32 %v2612_v30, %v2436_v32  ;;  %v2540_v41 = vld [vmem:[#allocation6 + $0x154] sm:$0xf] }
  0x6c   : > { %1262 = vmatpush.bf16.msrb.mxu1 %v2331_v33  ;;  %1290 = vmatpush.bf16.msrb.mxu3 %v2335_v38  ;;  %v2563_v4 = vld [vmem:[#allocation6 + $0x20c] sm:$0xf]  ;;  %v1983_v15 = vor.u32 %v2499_v1, %v1980_v3  ;;  %v2179_v33 = vor.u32 %v2552_v24, %v2178_v23  ;;  %v2544_v37 = vld [vmem:[#allocation6 + $0x16c] sm:$0xf0]  ;;  %v2148_v42 = vld [vmem:[#allocation6 + $0x170] sm:$0xf0] }
  0x6d   : > { %v2236_v5 = vld [vmem:[#allocation6 + $0x228] sm:$0xf0]  ;;  %v2402_v38 = vld [vmem:[#allocation6 + $0x350] sm:$0xf]  ;;  %v2604_v43 = vld [vmem:[#allocation6 + $0x354] sm:$0xf]  ;;  %v2151_v48 = vor.u32 %v2540_v41, %v2148_v42 }
  0x6e   : > { %1249 = vmatpush.bf16.msrb.mxu0 %v2043_v44  ;;  %1277 = vmatpush.bf16.msrb.mxu2 %v2047_v46  ;;  %v2239_v19 = vor.u32 %v2563_v4, %v2236_v5  ;;  %v2608_v40 = vld [vmem:[#allocation6 + $0x36c] sm:$0xf0]  ;;  %v2404_v44 = vld [vmem:[#allocation6 + $0x370] sm:$0xf0]  ;;  %v2147_v46 = vor.u32 %v2544_v37, %v2146_v36 }
  0x6f   : > { %v2403_v47 = vor.u32 %v2608_v40, %v2402_v38  ;;  %v2114_v49 = vld [vmem:[#allocation6 + $0x110] sm:$0xf]  ;;  %v2407_v53 = vor.u32 %v2604_v43, %v2404_v44  ;;  %v2532_v56 = vld [vmem:[#allocation6 + $0x114] sm:$0xf] }
  0x70   : > { %1263 = vmatpush.bf16.msrb.mxu1 %v2299_v45  ;;  %1291 = vmatpush.bf16.msrb.mxu3 %v2303_v50  ;;  %v3235_v45 = vld [vmem:[#allocation8 + $0x8] sm:$0xff]  ;;  %v2536_v50 = vld [vmem:[#allocation6 + $0x12c] sm:$0xf0]  ;;  %v2116_v57 = vld [vmem:[#allocation6 + $0x130] sm:$0xf0] }
  0x71   : > { %v2370_v52 = vld [vmem:[#allocation6 + $0x310] sm:$0xf]  ;;  %1479 = vrot.lane.b32.xlu2 %v3235_v45, %s3023_s1  ;;  %v2372_v59 = vld [vmem:[#allocation6 + $0x330] sm:$0xf0]  ;;  %v2115_v60 = vor.u32 %v2536_v50, %v2114_v49 }
  0x72   : > { %1250 = vmatpush.bf16.msrb.mxu0 %v2011_v58  ;;  %1278 = vmatpush.bf16.msrb.mxu2 %v2015_v62  ;;  %v2600_v54 = vld [vmem:[#allocation6 + $0x32c] sm:$0xf0]  ;;  %v2596_v58 = vld [vmem:[#allocation6 + $0x314] sm:$0xf]  ;;  %v2119_v62 = vor.u32 %v2532_v56, %v2116_v57  ;;  %v2621_v56 = vld [vmem:[#allocation6 + $0x3dc] sm:$0xf] }
  0x73   : > { %v2082_v63 = vld [vmem:[#allocation6 + $0xd0] sm:$0xf]  ;;  %v2524_v4 = vld [vmem:[#allocation6 + $0xd4] sm:$0xf] }
  0x74   : > { %1264 = vmatpush.bf16.msrb.mxu1 %v2267_v61  ;;  %1292 = vmatpush.bf16.msrb.mxu3 %v2271_v2  ;;  %v2371_v61 = vor.u32 %v2600_v54, %v2370_v52  ;;  %v2528_v0 = vld [vmem:[#allocation6 + $0xec] sm:$0xf0]  ;;  %v2375_v2 = vor.u32 %v2596_v58, %v2372_v59  ;;  %v2084_v5 = vld [vmem:[#allocation6 + $0xf0] sm:$0xf0]  ;;  %v2220_v54 = vld [vmem:[#allocation6 + $0x1f8] sm:$0xf0] }
  0x75   : > { %v2338_v1 = vld [vmem:[#allocation6 + $0x2d0] sm:$0xf]  ;;  %v2588_v7 = vld [vmem:[#allocation6 + $0x2d4] sm:$0xf]  ;;  %v2083_v9 = vor.u32 %v2528_v0, %v2082_v63  ;;  %v2087_v11 = vor.u32 %v2524_v4, %v2084_v5  ;;  %v2476_v58 = vld [vmem:[#allocation6 + $0x3f8] sm:$0xf0] }
  0x76   : > { %1251 = vmatpush.bf16.msrb.mxu0 %v1979_v10  ;;  %1279 = vmatpush.bf16.msrb.mxu2 %v1983_v15  ;;  %v2592_v3 = vld [vmem:[#allocation6 + $0x2ec] sm:$0xf0]  ;;  %v2340_v8 = vld [vmem:[#allocation6 + $0x2f0] sm:$0xf0]  ;;  %v2549_v59 = vld [vmem:[#allocation6 + $0x19c] sm:$0xf] }
  0x77   : > { %v2339_v10 = vor.u32 %v2592_v3, %v2338_v1  ;;  %v2050_v12 = vld [vmem:[#allocation6 + $0x90] sm:$0xf]  ;;  %v2343_v15 = vor.u32 %v2588_v7, %v2340_v8  ;;  %v2516_v17 = vld [vmem:[#allocation6 + $0x94] sm:$0xf]  ;;  %v2444_v63 = vld [vmem:[#allocation6 + $0x3b8] sm:$0xf0] }
  0x78   : > { %1265 = vmatpush.bf16.msrb.mxu1 %v2235_v14  ;;  %1293 = vmatpush.bf16.msrb.mxu3 %v2239_v19  ;;  %v2520_v13 = vld [vmem:[#allocation6 + $0xac] sm:$0xf0]  ;;  %v2052_v19 = vld [vmem:[#allocation6 + $0xb0] sm:$0xf0]  ;;  %v2561_v3 = vld [vmem:[#allocation6 + $0x1f4] sm:$0xf0] }
  0x79   : > { %1252 = vmatmul.bf16.vlgmr.msrb.gmra.mxu0 %v3212_v51  ;;  %1280 = vmatmul.bf16.vlgmr.msrb.gmra.mxu2 %v3212_v51  ;;  %v2306_v14 = vld [vmem:[#allocation6 + $0x290] sm:$0xf]  ;;  %v2055_v24 = vor.u32 %v2516_v17, %v2052_v19  ;;  %v2508_v30 = vld [vmem:[#allocation6 + $0x54] sm:$0xf]  ;;  %v2474_v4 = vld [vmem:[#allocation6 + $0x3d8] sm:$0xf] }
  0x7a   : > { %1300 = vmatpush.bf16.msra.mxu0 %v2211_v20  ;;  %1328 = vmatpush.bf16.msra.mxu2 %v2215_v22  ;;  %v2584_v16 = vld [vmem:[#allocation6 + $0x2ac] sm:$0xf0]  ;;  %v2580_v20 = vld [vmem:[#allocation6 + $0x294] sm:$0xf]  ;;  %v2051_v22 = vor.u32 %v2520_v13, %v2050_v12  ;;  %v2625_v7 = vld [vmem:[#allocation6 + $0x3f4] sm:$0xf0] }
  0x7b   : > { %1266 = vmatmul.bf16.vlgmr.msrb.gmra.mxu1 %v3214_v55  ;;  %1294 = vmatmul.bf16.vlgmr.msrb.gmra.mxu3 %v3214_v55  ;;  %v2307_v23 = vor.u32 %v2584_v16, %v2306_v14  ;;  %v2018_v25 = vld [vmem:[#allocation6 + $0x50] sm:$0xf]  ;;  %v2020_v32 = vld [vmem:[#allocation6 + $0x70] sm:$0xf0]  ;;  %v2475_v8 = vor.u32 %v2625_v7, %v2474_v4  ;;  %v2412_v14 = vld [vmem:[#allocation6 + $0x378] sm:$0xf0] }
  0x7c   : > { %1314 = vmatpush.bf16.msra.mxu1 %v2467_v21  ;;  %1342 = vmatpush.bf16.msra.mxu3 %v2471_v26  ;;  %v2308_v21 = vld [vmem:[#allocation6 + $0x2b0] sm:$0xf0]  ;;  %v2512_v26 = vld [vmem:[#allocation6 + $0x6c] sm:$0xf0]  ;;  %v2023_v37 = vor.u32 %v2508_v30, %v2020_v32  ;;  %v2553_v16 = vld [vmem:[#allocation6 + $0x1b4] sm:$0xf0] }
  0x7d   : > { %v2274_v27 = vld [vmem:[#allocation6 + $0x250] sm:$0xf]  ;;  %v2311_v28 = vor.u32 %v2580_v20, %v2308_v21  ;;  %v2500_v43 = vld [vmem:[#allocation6 + $0x14] sm:$0xf]  ;;  %v2529_v7 = vld [vmem:[#allocation6 + $0xf4] sm:$0xf0] }
  0x7e   : > { %1301 = vmatpush.bf16.msra.mxu0 %v2179_v33  ;;  %1329 = vmatpush.bf16.msra.mxu2 %v2183_v35  ;;  %v2576_v29 = vld [vmem:[#allocation6 + $0x26c] sm:$0xf0]  ;;  %v2572_v33 = vld [vmem:[#allocation6 + $0x254] sm:$0xf]  ;;  %v2019_v35 = vor.u32 %v2512_v26, %v2018_v25  ;;  %v2533_v26 = vld [vmem:[#allocation6 + $0x11c] sm:$0xf] }
  0x7f   : > { %v2275_v36 = vor.u32 %v2576_v29, %v2274_v27  ;;  %v1986_v38 = vld [vmem:[#allocation6 + $0x10] sm:$0xf]  ;;  %v1988_v44 = vld [vmem:[#allocation6 + $0x30] sm:$0xf0]  ;;  %v2124_v27 = vld [vmem:[#allocation6 + $0x138] sm:$0xf0] }
  0x80   : > { %1315 = vmatpush.bf16.msra.mxu1 %v2435_v34  ;;  %1343 = vmatpush.bf16.msra.mxu3 %v2439_v39  ;;  %v2276_v34 = vld [vmem:[#allocation6 + $0x270] sm:$0xf0]  ;;  %v2504_v39 = vld [vmem:[#allocation6 + $0x2c] sm:$0xf0]  ;;  %v1991_v50 = vor.u32 %v2500_v43, %v1988_v44  ;;  %v2127_v32 = vor.u32 %v2533_v26, %v2124_v27  ;;  %v2092_v43 = vld [vmem:[#allocation6 + $0xf8] sm:$0xf0] }
  0x81   : > { %v2242_v40 = vld [vmem:[#allocation6 + $0x210] sm:$0xf]  ;;  %v2279_v41 = vor.u32 %v2572_v33, %v2276_v34  ;;  %v2380_v33 = vld [vmem:[#allocation6 + $0x338] sm:$0xf0]  ;;  %v2058_v26 = vld [vmem:[#allocation6 + $0x98] sm:$0xf] }
  0x82   : > { %1302 = vmatpush.bf16.msra.mxu0 %v2147_v46  ;;  %1330 = vmatpush.bf16.msra.mxu2 %v2151_v48  ;;  %v2568_v42 = vld [vmem:[#allocation6 + $0x22c] sm:$0xf0]  ;;  %v2564_v46 = vld [vmem:[#allocation6 + $0x214] sm:$0xf]  ;;  %v1987_v48 = vor.u32 %v2504_v39, %v1986_v38  ;;  %v2609_v39 = vld [vmem:[#allocation6 + $0x374] sm:$0xf0] }
  0x83   : > { %v2243_v49 = vor.u32 %v2568_v42, %v2242_v40  ;;  %v2525_v42 = vld [vmem:[#allocation6 + $0xdc] sm:$0xf]  ;;  %v2521_v27 = vld [vmem:[#allocation6 + $0xb4] sm:$0xf0] }
  0x84   : > { %1316 = vmatpush.bf16.msra.mxu1 %v2403_v47  ;;  %1344 = vmatpush.bf16.msra.mxu3 %v2407_v53  ;;  %v2244_v47 = vld [vmem:[#allocation6 + $0x230] sm:$0xf0]  ;;  %v2557_v53 = vld [vmem:[#allocation6 + $0x1dc] sm:$0xf] }
  0x85   : > { %v2247_v52 = vor.u32 %v2564_v46, %v2244_v47  ;;  %v2223_v57 = vor.u32 %v2557_v53, %v2220_v54  ;;  %v2589_v44 = vld [vmem:[#allocation6 + $0x2dc] sm:$0xf]  ;;  %v2095_v47 = vor.u32 %v2525_v42, %v2092_v43  ;;  %v2537_v53 = vld [vmem:[#allocation6 + $0x134] sm:$0xf0] }
  0x86   : > { %1303 = vmatpush.bf16.msra.mxu0 %v2115_v60  ;;  %1331 = vmatpush.bf16.msra.mxu2 %v2119_v62  ;;  %v2188_v60 = vld [vmem:[#allocation6 + $0x1b8] sm:$0xf0]  ;;  %v2378_v54 = vld [vmem:[#allocation6 + $0x318] sm:$0xf] }
  0x87   : > { %v2613_v62 = vld [vmem:[#allocation6 + $0x39c] sm:$0xf]  ;;  %v2191_v0 = vor.u32 %v2549_v59, %v2188_v60  ;;  %v2513_v42 = vld [vmem:[#allocation6 + $0x74] sm:$0xf0] }
  0x88   : > { %1317 = vmatpush.bf16.msra.mxu1 %v2371_v61  ;;  %1345 = vmatpush.bf16.msra.mxu3 %v2375_v2  ;;  %v2479_v61 = vor.u32 %v2621_v56, %v2476_v58  ;;  %v2447_v1 = vor.u32 %v2613_v62, %v2444_v63  ;;  %v2218_v2 = vld [vmem:[#allocation6 + $0x1d8] sm:$0xf]  ;;  %v2517_v63 = vld [vmem:[#allocation6 + $0x9c] sm:$0xf] }
  0x89   : > { %v2219_v5 = vor.u32 %v2561_v3, %v2218_v2  ;;  %v2316_v3 = vld [vmem:[#allocation6 + $0x2b8] sm:$0xf0] }
  0x8a   : > { %1304 = vmatpush.bf16.msra.mxu0 %v2083_v9  ;;  %1332 = vmatpush.bf16.msra.mxu2 %v2087_v11  ;;  %v2541_v9 = vld [vmem:[#allocation6 + $0x15c] sm:$0xf] }
  0x8b   : > { %v2605_v11 = vld [vmem:[#allocation6 + $0x35c] sm:$0xf] }
  0x8c   : > { %1318 = vmatpush.bf16.msra.mxu1 %v2339_v10  ;;  %1346 = vmatpush.bf16.msra.mxu3 %v2343_v15  ;;  %v2156_v10 = vld [vmem:[#allocation6 + $0x178] sm:$0xf0]  ;;  %v2186_v15 = vld [vmem:[#allocation6 + $0x198] sm:$0xf]  ;;  %v2415_v20 = vor.u32 %v2605_v11, %v2412_v14 }
  0x8d   : > { %v2159_v13 = vor.u32 %v2541_v9, %v2156_v10  ;;  %v2187_v21 = vor.u32 %v2553_v16, %v2186_v15  ;;  %v2593_v11 = vld [vmem:[#allocation6 + $0x2f4] sm:$0xf0]  ;;  %v2509_v14 = vld [vmem:[#allocation6 + $0x5c] sm:$0xf] }
  0x8e   : > { %1305 = vmatpush.bf16.msra.mxu0 %v2051_v22  ;;  %1333 = vmatpush.bf16.msra.mxu2 %v2055_v24  ;;  %v2442_v22 = vld [vmem:[#allocation6 + $0x398] sm:$0xf]  ;;  %v2028_v15 = vld [vmem:[#allocation6 + $0x78] sm:$0xf0] }
  0x8f   : > { %v2573_v16 = vld [vmem:[#allocation6 + $0x25c] sm:$0xf] }
  0x90   : > { %1319 = vmatpush.bf16.msra.mxu1 %v2307_v23  ;;  %1347 = vmatpush.bf16.msra.mxu3 %v2311_v28  ;;  %v2617_v23 = vld [vmem:[#allocation6 + $0x3b4] sm:$0xf0]  ;;  %v2597_v28 = vld [vmem:[#allocation6 + $0x31c] sm:$0xf] }
  0x91   : > { %v2443_v25 = vor.u32 %v2617_v23, %v2442_v22  ;;  %v2383_v34 = vor.u32 %v2597_v28, %v2380_v33  ;;  %v2284_v22 = vld [vmem:[#allocation6 + $0x278] sm:$0xf0]  ;;  %v2314_v28 = vld [vmem:[#allocation6 + $0x298] sm:$0xf] }
  0x92   : > { %1306 = vmatpush.bf16.msra.mxu0 %v2019_v35  ;;  %1334 = vmatpush.bf16.msra.mxu2 %v2023_v37  ;;  %v2154_v35 = vld [vmem:[#allocation6 + $0x158] sm:$0xf] }
  0x93   : > { %v2410_v37 = vld [vmem:[#allocation6 + $0x358] sm:$0xf] }
  0x94   : > { %1320 = vmatpush.bf16.msra.mxu1 %v2275_v36  ;;  %1348 = vmatpush.bf16.msra.mxu3 %v2279_v41  ;;  %v2545_v36 = vld [vmem:[#allocation6 + $0x174] sm:$0xf0]  ;;  %v2411_v41 = vor.u32 %v2609_v39, %v2410_v37  ;;  %v1996_v37 = vld [vmem:[#allocation6 + $0x38] sm:$0xf0] }
  0x95   : > { %v2155_v38 = vor.u32 %v2545_v36, %v2154_v35  ;;  %v2501_v36 = vld [vmem:[#allocation6 + $0x1c] sm:$0xf] }
  0x96   : > { %1307 = vmatpush.bf16.msra.mxu0 %v1987_v48  ;;  %1335 = vmatpush.bf16.msra.mxu2 %v1991_v50  ;;  %v2348_v48 = vld [vmem:[#allocation6 + $0x2f8] sm:$0xf0]  ;;  %v1999_v39 = vor.u32 %v2501_v36, %v1996_v37 }
  0x97   : > { %v2351_v50 = vor.u32 %v2589_v44, %v2348_v48 }
  0x98   : > { %1321 = vmatpush.bf16.msra.mxu1 %v2243_v49  ;;  %1349 = vmatpush.bf16.msra.mxu3 %v2247_v52  ;;  %v2122_v52 = vld [vmem:[#allocation6 + $0x118] sm:$0xf] }
  0x99   : > { %1308 = vmatmul.bf16.vlgmr.msra.gmra.mxu0 %v3212_v51  ;;  %1336 = vmatmul.bf16.vlgmr.msra.gmra.mxu2 %v3212_v51  ;;  %v2123_v56 = vor.u32 %v2537_v53, %v2122_v52  ;;  %v2505_v52 = vld [vmem:[#allocation6 + $0x34] sm:$0xf0] }
  0x9a   : > { %1384 = vmatpush.bf16.msrb.mxu2 %v2223_v57  ;;  %1356 = vmatpush.bf16.msrb.mxu0 %v2219_v5  ;;  %v2601_v57 = vld [vmem:[#allocation6 + $0x334] sm:$0xf0] }
  0x9b   : > { %1322 = vmatmul.bf16.vlgmr.msra.gmra.mxu1 %v3214_v55  ;;  %1350 = vmatmul.bf16.vlgmr.msra.gmra.mxu3 %v3214_v55  ;;  %v2379_v62 = vor.u32 %v2601_v57, %v2378_v54  ;;  %v2090_v5 = vld [vmem:[#allocation6 + $0xd8] sm:$0xf] }
  0x9c   : > { %1398 = vmatpush.bf16.msrb.mxu3 %v2479_v61  ;;  %1370 = vmatpush.bf16.msrb.mxu1 %v2475_v8  ;;  %v2346_v8 = vld [vmem:[#allocation6 + $0x2d8] sm:$0xf]  ;;  %v2091_v10 = vor.u32 %v2529_v7, %v2090_v5 }
  0x9d   : > { %v2250_v53 = vld [vmem:[#allocation6 + $0x218] sm:$0xf] }
  0x9e   : > { %1385 = vmatpush.bf16.msrb.mxu2 %v2191_v0  ;;  %1357 = vmatpush.bf16.msrb.mxu0 %v2187_v21  ;;  %v2060_v0 = vld [vmem:[#allocation6 + $0xb8] sm:$0xf0]  ;;  %v2031_v21 = vor.u32 %v2509_v14, %v2028_v15 }
  0x9f   : > { %v2063_v2 = vor.u32 %v2517_v63, %v2060_v0 }
  0xa0   : > { %1399 = vmatpush.bf16.msrb.mxu3 %v2447_v1  ;;  %1371 = vmatpush.bf16.msrb.mxu1 %v2443_v25  ;;  %v2581_v1 = vld [vmem:[#allocation6 + $0x29c] sm:$0xf]  ;;  %v2287_v25 = vor.u32 %v2573_v16, %v2284_v22 }
  0xa1   : > { %v2319_v4 = vor.u32 %v2581_v1, %v2316_v3 }
  0xa2   : > { %1386 = vmatpush.bf16.msrb.mxu2 %v2159_v13  ;;  %1358 = vmatpush.bf16.msrb.mxu0 %v2155_v38  ;;  %v2347_v13 = vor.u32 %v2593_v11, %v2346_v8  ;;  %v2565_v38 = vld [vmem:[#allocation6 + $0x21c] sm:$0xf] }
  0xa4   : > { %1400 = vmatpush.bf16.msrb.mxu3 %v2415_v20  ;;  %1372 = vmatpush.bf16.msrb.mxu1 %v2411_v41  ;;  %v2026_v41 = vld [vmem:[#allocation6 + $0x58] sm:$0xf] }
  0xa5   : > { %v2027_v44 = vor.u32 %v2513_v42, %v2026_v41 }
  0xa6   : > { %1387 = vmatpush.bf16.msrb.mxu2 %v2127_v32  ;;  %1359 = vmatpush.bf16.msrb.mxu0 %v2123_v56  ;;  %v2585_v32 = vld [vmem:[#allocation6 + $0x2b4] sm:$0xf0] }
  0xa7   : > { %v2315_v35 = vor.u32 %v2585_v32, %v2314_v28  ;;  %v2569_v56 = vld [vmem:[#allocation6 + $0x234] sm:$0xf0] }
  0xa8   : > { %1401 = vmatpush.bf16.msrb.mxu3 %v2383_v34  ;;  %1373 = vmatpush.bf16.msrb.mxu1 %v2379_v62  ;;  %v2251_v57 = vor.u32 %v2569_v56, %v2250_v53 }
  0xaa   : > { %1388 = vmatpush.bf16.msrb.mxu2 %v2095_v47  ;;  %1360 = vmatpush.bf16.msrb.mxu0 %v2091_v10  ;;  %v2577_v47 = vld [vmem:[#allocation6 + $0x274] sm:$0xf0] }
  0xac   : > { %1402 = vmatpush.bf16.msrb.mxu3 %v2351_v50  ;;  %1374 = vmatpush.bf16.msrb.mxu1 %v2347_v13  ;;  %v1994_v50 = vld [vmem:[#allocation6 + $0x18] sm:$0xf] }
  0xad   : > { %v1995_v54 = vor.u32 %v2505_v52, %v1994_v50 }
  0xae   : > { %1389 = vmatpush.bf16.msrb.mxu2 %v2063_v2 }
  0xb0   : > { %1403 = vmatpush.bf16.msrb.mxu3 %v2319_v4  ;;  %1375 = vmatpush.bf16.msrb.mxu1 %v2315_v35 }
  0xb2   : > { %1390 = vmatpush.bf16.msrb.mxu2 %v2031_v21 }
  0xb4   : > { %1404 = vmatpush.bf16.msrb.mxu3 %v2287_v25 }
  0xb6   : > { %1391 = vmatpush.bf16.msrb.mxu2 %v1999_v39 }
  0xb9   : > { %1392 = vmatmul.bf16.vlgmr.msrb.gmra.mxu2 %v3212_v51 }
  0xcf   : > { %v3244_v19 = vpop.permute.xlu0 %1457 }
  0xd6   : > { %v1197_v12 = vpop.f32.mrf.mxu0 }
  0xd7   : > { %v3264_v20 = vpop.permute.xlu0 %1459 }
  0xd8   : > { %v1211_v17 = vpop.f32.mrf.mxu1 }
  0xd9   : > { %v3246_v24 = vadd.f32 %v1211_v17, %v1197_v12 }
  0xdb   : > { %v1485_v29 = vmul.f32 %v3219_v6, %v3246_v24  ;;  %v1463_v30 = vmul.f32 %v3244_v19, %v3246_v24 }
  0xdc   : > { %v1225_v40 = vpop.f32.mrf.mxu2 }
  0xdd   : > { %1489 = vrot.lane.b32.xlu0 %v1485_v29, %s3023_s1  ;;  %1467 = vrot.lane.b32.xlu1 %v1463_v30, %s3023_s1  ;;  %v2059_v30 = vor.u32 %v2521_v27, %v2058_v26 }
  0xde   : > { %v1239_v46 = vpop.f32.mrf.mxu3  ;;  %v1199_v60 = vpop.f32.mrf.mxu0 }
  0xdf   : > { %v3254_v49 = vadd.f32 %v1239_v46, %v1225_v40  ;;  %1361 = vmatpush.bf16.msrb.mxu0 %v2059_v30  ;;  %v2252_v40 = vld [vmem:[#allocation6 + $0x238] sm:$0xf0]  ;;  %v2282_v46 = vld [vmem:[#allocation6 + $0x258] sm:$0xf] }
  0xe0   : > { %v1213_v61 = vpop.f32.mrf.mxu1  ;;  %v2255_v43 = vor.u32 %v2565_v38, %v2252_v40  ;;  %v2283_v48 = vor.u32 %v2577_v47, %v2282_v46  ;;  %v3348_v40 = vpop.permute.xlu2 %1477 }
  0xe1   : > { %v1510_v58 = vmul.f32 %v3244_v19, %v3254_v49  ;;  %v1524_v59 = vmul.f32 %v3219_v6, %v3254_v49  ;;  %v3262_v9 = vadd.f32 %v1213_v61, %v1199_v60  ;;  %v1508_v52 = vmul.f32 %v3228_v18, %v3254_v49 }
  0xe2   : > { %1405 = vmatpush.bf16.msrb.mxu3 %v2255_v43  ;;  %1376 = vmatpush.bf16.msrb.mxu1 %v2283_v48  ;;  %v1522_v53 = vmul.f32 %v3348_v40, %v3254_v49 }
  0xe3   : > { %1514 = vrot.lane.b32.xlu2 %v1510_v58, %s3023_s1  ;;  %v1464_v29 = vmul.f32 %v3264_v20, %v3262_v9  ;;  %1362 = vmatpush.bf16.msrb.mxu0 %v2027_v44  ;;  %v1486_v58 = vmul.f32 %v3224_v31, %v3262_v9 }
  0xe4   : > { %v1227_v12 = vpop.f32.mrf.mxu2 }
  0xe5   : > { %1528 = vrot.lane.b32.xlu1 %v1524_v59, %s3023_s1  ;;  %1406 = vmatmul.bf16.vlgmr.msrb.gmra.mxu3 %v3214_v55 }
  0xe6   : > { %v1241_v17 = vpop.f32.mrf.mxu3  ;;  %1377 = vmatpush.bf16.msrb.mxu1 %v2251_v57 }
  0xe7   : > { %v3266_v23 = vadd.f32 %v1241_v17, %v1227_v12  ;;  %1363 = vmatpush.bf16.msrb.mxu0 %v1995_v54 }
  0xe8   : > { %v3350_v41 = vpop.permute.xlu2 %1479 }
  0xe9   : > { %v1525_v33 = vmul.f32 %v3224_v31, %v3266_v23  ;;  %v1511_v34 = vmul.f32 %v3264_v20, %v3266_v23  ;;  %1378 = vmatmul.bf16.vlgmr.msrb.gmra.mxu1 %v3214_v55  ;;  %v1509_v49 = vmul.f32 %v3235_v45, %v3266_v23 }
  0xea   : > { %1364 = vmatmul.bf16.vlgmr.msrb.gmra.mxu0 %v3212_v51 }
  0xeb   : > { %1530 = vrot.lane.b32.xlu2 %v1525_v33, %s3023_s1  ;;  %1516 = vrot.lane.b32.xlu0 %v1511_v34, %s3023_s1 }
  0xed   : > { %1469 = vrot.lane.b32.xlu1 %v1464_v29, %s3023_s1 }
  0xf5   : > { %1491 = vrot.lane.b32.xlu1 %v1486_v58, %s3023_s1 }
  0xf6   : > { %v1253_v59 = vpop.f32.mrf.mxu0 }
  0xf8   : > { %v1267_v60 = vpop.f32.mrf.mxu1 }
  0xf9   : > { %v3283_v61 = vadd.f32 %v1267_v60, %v1253_v59  ;;  %v1523_v60 = vmul.f32 %v3350_v41, %v3266_v23 }
  0xfb   : > { %v1562_v62 = vmul.f32 %v3219_v6, %v3283_v61  ;;  %v1548_v63 = vmul.f32 %v3244_v19, %v3283_v61 }
  0xfc   : > { %v1281_v0 = vpop.f32.mrf.mxu2 }
  0xfd   : > { %1566 = vrot.lane.b32.xlu2 %v1562_v62, %s3023_s1  ;;  %1552 = vrot.lane.b32.xlu0 %v1548_v63, %s3023_s1 }
  0xfe   : > { %v1295_v1 = vpop.f32.mrf.mxu3  ;;  %v1255_v3 = vpop.f32.mrf.mxu0 }
  0xff   : > { %v3292_v2 = vadd.f32 %v1295_v1, %v1281_v0 }
 0x100   : > { %v1269_v4 = vpop.f32.mrf.mxu1 }
 0x101   : > { %v1586_v51 = vmul.f32 %v3244_v19, %v3292_v2  ;;  %v1600_v55 = vmul.f32 %v3219_v6, %v3292_v2  ;;  %v3300_v5 = vadd.f32 %v1269_v4, %v1255_v3 }
 0x103   : > { %1590 = vrot.lane.b32.xlu1 %v1586_v51, %s3023_s1  ;;  %v1549_v12 = vmul.f32 %v3264_v20, %v3300_v5  ;;  %v1563_v13 = vmul.f32 %v3224_v31, %v3300_v5 }
 0x104   : > { %v1283_v7 = vpop.f32.mrf.mxu2 }
 0x105   : > { %1604 = vrot.lane.b32.xlu0 %v1600_v55, %s3023_s1 }
 0x106   : > { %v1297_v8 = vpop.f32.mrf.mxu3 }
 0x107   : > { %v3302_v10 = vadd.f32 %v1297_v8, %v1283_v7  ;;  %v1454_v7 = vmul.f32 %v3235_v45, %v3262_v9  ;;  %v1484_v8 = vmul.f32 %v3350_v41, %v3262_v9 }
 0x109   : > { %v1587_v11 = vmul.f32 %v3264_v20, %v3302_v10  ;;  %v1601_v14 = vmul.f32 %v3224_v31, %v3302_v10 }
 0x10b   : > { %1592 = vrot.lane.b32.xlu2 %v1587_v11, %s3023_s1  ;;  %1554 = vrot.lane.b32.xlu1 %v1549_v12, %s3023_s1 }
 0x10d   : > { %1568 = vrot.lane.b32.xlu0 %v1563_v13, %s3023_s1 }
 0x113   : > { %1606 = vrot.lane.b32.xlu1 %v1601_v14, %s3023_s1 }
 0x116   : > { %v1309_v15 = vpop.f32.mrf.mxu0 }
 0x118   : > { %v1323_v16 = vpop.f32.mrf.mxu1 }
 0x119   : > { %v3316_v17 = vadd.f32 %v1323_v16, %v1309_v15  ;;  %v1560_v16 = vmul.f32 %v3348_v40, %v3283_v61 }
 0x11b   : > { %v1624_v21 = vmul.f32 %v3244_v19, %v3316_v17  ;;  %v1638_v22 = vmul.f32 %v3219_v6, %v3316_v17 }
 0x11c   : > { %v1337_v25 = vpop.f32.mrf.mxu2 }
 0x11d   : > { %1628 = vrot.lane.b32.xlu2 %v1624_v21, %s3023_s1  ;;  %1642 = vrot.lane.b32.xlu1 %v1638_v22, %s3023_s1  ;;  %v1546_v21 = vmul.f32 %v3228_v18, %v3283_v61 }
 0x11e   : > { %v1351_v26 = vpop.f32.mrf.mxu3  ;;  %v1311_v27 = vpop.f32.mrf.mxu0 }
 0x11f   : > { %v3324_v28 = vadd.f32 %v1351_v26, %v1337_v25 }
 0x120   : > { %v1325_v29 = vpop.f32.mrf.mxu1 }
 0x121   : > { %v3326_v30 = vadd.f32 %v1325_v29, %v1311_v27  ;;  %v1660_v32 = vmul.f32 %v3244_v19, %v3324_v28  ;;  %v1674_v19 = vmul.f32 %v3219_v6, %v3324_v28  ;;  %v1453_v6 = vmul.f32 %v3228_v18, %v3246_v24 }
 0x123   : > { %v1639_v33 = vmul.f32 %v3224_v31, %v3326_v30  ;;  %1664 = vrot.lane.b32.xlu0 %v1660_v32, %s3023_s1  ;;  %v1625_v37 = vmul.f32 %v3264_v20, %v3326_v30 }
 0x124   : > { %v1339_v34 = vpop.f32.mrf.mxu2 }
 0x125   : > { %1644 = vrot.lane.b32.xlu2 %v1639_v33, %s3023_s1 }
 0x126   : > { %v1353_v35 = vpop.f32.mrf.mxu3 }
 0x127   : > { %v3334_v36 = vadd.f32 %v1353_v35, %v1339_v34  ;;  %v1584_v35 = vmul.f32 %v3228_v18, %v3292_v2 }
 0x129   : > { %v1661_v38 = vmul.f32 %v3264_v20, %v3334_v36  ;;  %v1675_v39 = vmul.f32 %v3224_v31, %v3334_v36  ;;  %v1483_v20 = vmul.f32 %v3348_v40, %v3246_v24 }
 0x12b   : > { %1630 = vrot.lane.b32.xlu0 %v1625_v37, %s3023_s1  ;;  %1666 = vrot.lane.b32.xlu1 %v1661_v38, %s3023_s1  ;;  %v1598_v38 = vmul.f32 %v3348_v40, %v3292_v2 }
 0x12d   : > { %1678 = vrot.lane.b32.xlu2 %v1674_v19, %s3023_s1 }
 0x133   : > { %1680 = vrot.lane.b32.xlu0 %v1675_v39, %s3023_s1  ;;  %s2884_s1 = scalar_lea.hbm %s3527_s4, 64 }
 0x134   : > { %p2886_p12 = scmp.lt.s32.totalorder %s2884_s1, %s2880_s12 }
 0x136   : > { %p2887_p13 = por %p2886_p12, %p2885_p10 }
 0x138   : > { %p2888_p0 = pnand %p2887_p13, %p2883_p8 }
 0x13c   : > { %v1393_v61 = vpop.f32.mrf.mxu2 }
 0x13d   : > { %v1515_v47 = vpop.permute.xlu2 %1514 }
 0x13e   : > { %v1520_v54 = vsub.f32 %v1508_v52, %v1515_v47  ;;  %v1547_v52 = vmul.f32 %v3235_v45, %v3300_v5 }
 0x145   : > { %v1531_v59 = vpop.permute.xlu2 %1530 }
 0x146   : > { %v1535_v0 = vadd.f32 %v1531_v59, %v1523_v60 }
 0x14f   : > { %v1490_v42 = vpop.permute.xlu0 %1489  ;;  %v1468_v43 = vpop.permute.xlu1 %1467 }
 0x150   : > { %v1495_v44 = vadd.f32 %v1490_v42, %v1483_v20  ;;  %v1473_v46 = vsub.f32 %v1453_v6, %v1468_v43 }
 0x152   : > { %v1498_v31 = vsel %vm1497_vm0, %v1473_v46, %v1495_v44 }
 0x153   : > { %v1500_v48 = vmul.f32 0.088388346, %v1498_v31 }
 0x155   : > { %v1502_v50 = vpack.c.bf16 %v1500_v48, %v1500_v48 }
 0x157   : > { %1504 = vst [vmem:[%s3362_s3] sm:$0xf] %v1502_v50  ;;  %v1529_v24 = vpop.permute.xlu1 %1528  ;;  %v1567_v14 = vpop.permute.xlu2 %1566 }
 0x158   : > { %v1534_v56 = vadd.f32 %v1529_v24, %v1522_v53  ;;  %v1572_v26 = vadd.f32 %v1567_v14, %v1560_v16  ;;  %v1561_v24 = vmul.f32 %v3350_v41, %v3300_v5  ;;  %v1585_v5 = vmul.f32 %v3235_v45, %v3302_v10 }
 0x15a   : > { %v1536_v57 = vsel %vm1497_vm0, %v1520_v54, %v1534_v56  ;;  %v1395_v54 = vpop.f32.mrf.mxu2 }
 0x15b   : > { %v1538_v58 = vmul.f32 0.088388346, %v1536_v57 }
 0x15d   : > { %v1540_v62 = vpack.c.bf16 %v1538_v58, %v1538_v58  ;;  %v1517_v63 = vpop.permute.xlu0 %1516 }
 0x15e   : > { %v1521_v1 = vsub.f32 %v1509_v49, %v1517_v63 }
 0x15f   : > { %1542 = vst [vmem:[%s3362_s3 + $0x4] sm:$0xf] %v1540_v62  ;;  %v1470_v51 = vpop.permute.xlu1 %1469 }
 0x160   : > { %v1537_v55 = vsel %vm1497_vm0, %v1521_v1, %v1535_v0  ;;  %v1474_v12 = vsub.f32 %v1454_v7, %v1470_v51 }
 0x161   : > { %v1539_v3 = vmul.f32 0.088388346, %v1537_v55  ;;  %v1599_v55 = vmul.f32 %v3350_v41, %v3302_v10 }
 0x163   : > { %v1541_v4 = vpack.c.bf16 %v1539_v3, %v1539_v3 }
 0x165   : > { %1543 = vst [vmem:[%s3362_s3 + $0x14] sm:$0xf] %v1541_v4  ;;  %v1593_v32 = vpop.permute.xlu2 %1592 }
 0x166   : > { %v1379_v39 = vpop.f32.mrf.mxu1  ;;  %v1597_v4 = vsub.f32 %v1585_v5, %v1593_v32 }
 0x167   : > { %v1492_v11 = vpop.permute.xlu1 %1491  ;;  %v1365_v34 = vpop.f32.mrf.mxu0 }
 0x168   : > { %v1496_v23 = vadd.f32 %v1492_v11, %v1484_v8  ;;  %v1407_v42 = vpop.f32.mrf.mxu3  ;;  %v1380_v43 = vadd.f32 %v1379_v39, %v1365_v34 }
 0x169   : > { %v1408_v44 = vadd.f32 %v1407_v42, %v1393_v61 }
 0x16a   : > { %v1499_v13 = vsel %vm1497_vm0, %v1474_v12, %v1496_v23  ;;  %v1622_v23 = vmul.f32 %v3228_v18, %v3316_v17 }
 0x16b   : > { %v1501_v15 = vmul.f32 0.088388346, %v1499_v13  ;;  %v1696_v31 = vpack.c.bf16 %v1408_v44, %v1380_v43  ;;  %v1636_v13 = vmul.f32 %v3348_v40, %v3316_v17 }
 0x16d   : > { %v1503_v22 = vpack.c.bf16 %v1501_v15, %v1501_v15  ;;  %1698 = vst [vmem:[%s3393_s29] sm:$0xff] %v1696_v31 }
 0x16e   : > { %v1381_v57 = vpop.f32.mrf.mxu1 }
 0x16f   : > { %v1553_v25 = vpop.permute.xlu0 %1552  ;;  %1505 = vst [vmem:[%s3362_s3 + $0x10] sm:$0xf] %v1503_v22  ;;  %v1367_v2 = vpop.f32.mrf.mxu0 }
 0x170   : > { %v1558_v27 = vsub.f32 %v1546_v21, %v1553_v25  ;;  %v1382_v60 = vadd.f32 %v1381_v57, %v1367_v2  ;;  %v1409_v62 = vpop.f32.mrf.mxu3 }
 0x171   : > { %v1410_v49 = vadd.f32 %v1409_v62, %v1395_v54 }
 0x172   : > { %v1574_v9 = vsel %vm1497_vm0, %v1558_v27, %v1572_v26 }
 0x173   : > { %v1576_v29 = vmul.f32 0.088388346, %v1574_v9  ;;  %v1697_v1 = vpack.c.bf16 %v1410_v49, %v1382_v60 }
 0x175   : > { %v1578_v33 = vpack.c.bf16 %v1576_v29, %v1576_v29  ;;  %v1591_v37 = vpop.permute.xlu1 %1590  ;;  %1699 = vst [vmem:[%s3393_s29 + $0x8] sm:$0xff] %v1697_v1 }
 0x176   : > { %v1596_v20 = vsub.f32 %v1584_v35, %v1591_v37 }
 0x177   : > { %1580 = vst [vmem:[%s3362_s3 + $0x8] sm:$0xf] %v1578_v33  ;;  %v1605_v19 = vpop.permute.xlu0 %1604  ;;  %v3390_v48 = vpop.permute.xlu2 %1628 }
 0x178   : > { %v1610_v6 = vadd.f32 %v1605_v19, %v1598_v38  ;;  %v1634_v15 = vsub.f32 %v1622_v23, %v3390_v48 }
 0x17a   : > { %v1612_v46 = vsel %vm1497_vm0, %v1596_v20, %v1610_v6 }
 0x17b   : > { %v1614_v47 = vmul.f32 0.088388346, %v1612_v46 }
 0x17d   : > { %v1616_v50 = vpack.c.bf16 %v1614_v47, %v1614_v47  ;;  %v1555_v53 = vpop.permute.xlu1 %1554 }
 0x17e   : > { %v1559_v58 = vsub.f32 %v1547_v52, %v1555_v53 }
 0x17f   : > { %1618 = vst [vmem:[%s3362_s3 + $0xc] sm:$0xf] %v1616_v50  ;;  %v1569_v56 = vpop.permute.xlu0 %1568  ;;  %v1645_v7 = vpop.permute.xlu2 %1644 }
 0x180   : > { %v1573_v59 = vadd.f32 %v1569_v56, %v1561_v24 }
 0x182   : > { %v1575_v63 = vsel %vm1497_vm0, %v1559_v58, %v1573_v59 }
 0x183   : > { %v1577_v0 = vmul.f32 0.088388346, %v1575_v63 }
 0x185   : > { %v1579_v51 = vpack.c.bf16 %v1577_v0, %v1577_v0  ;;  %v1607_v3 = vpop.permute.xlu1 %1606 }
 0x186   : > { %v1611_v8 = vadd.f32 %v1607_v3, %v1599_v55 }
 0x187   : > { %1581 = vst [vmem:[%s3362_s3 + $0x18] sm:$0xf] %v1579_v51 }
 0x188   : > { %v1613_v11 = vsel %vm1497_vm0, %v1597_v4, %v1611_v8 }
 0x189   : > { %v1615_v12 = vmul.f32 0.088388346, %v1613_v11 }
 0x18b   : > { %v1617_v10 = vpack.c.bf16 %v1615_v12, %v1615_v12 }
 0x18d   : > { %1619 = vst [vmem:[%s3362_s3 + $0x1c] sm:$0xf] %v1617_v10 }
 0x18f   : > { %v1643_v14 = vpop.permute.xlu1 %1642 }
 0x190   : > { %v1648_v16 = vadd.f32 %v1643_v14, %v1636_v13 }
 0x191   : > { %2891 = shalt.err (!%p2888_p0)
}
 0x192   : > { %s3024_s17 = smov 256   ;;  %s3025_s3 = smov 16   ;;  %v1679_v17 = vpop.permute.xlu2 %1678  ;;  %v1650_v21 = vsel %vm1497_vm0, %v1634_v15, %v1648_v16  ;;  %v1672_v22 = vmul.f32 %v3348_v40, %v3324_v28  ;;  %v1658_v26 = vmul.f32 %v3228_v18, %v3324_v28  ;;  %v1637_v40 = vmul.f32 %v3350_v41, %v3326_v30 }
 0x193   : > { %2646 = dma.vmem_to_hbm [thread:$0]  (%p3156_p3), %s1725_s20, 512, %s1727_s11, %s1701_s14, %s3024_s17, %s3024_s17, %s3025_s3   ;;  %v1652_v25 = vpack.c.bf16 %v1650_v21, %v1650_v21  ;;  %v1623_v18 = vmul.f32 %v3235_v45, %v3326_v30  ;;  %v1659_v19 = vmul.f32 %v3235_v45, %v3334_v36  ;;  %v1673_v30 = vmul.f32 %v3350_v41, %v3334_v36 }
 0x194   : > { %v1684_v9 = vadd.f32 %v1679_v17, %v1672_v22  ;;  %s3437_s8 = scalar_lea.vmem [#allocation12], %s3190_s28  ;;  %v1649_v34 = vadd.f32 %v1645_v7, %v1637_v40  ;;  %s2629_s28 = sshll.u32 %s3006_s24, 4 }
 0x195   : > { %v1665_v27 = vpop.permute.xlu0 %1664  ;;  %1654 = vst [vmem:[%s3437_s8] sm:$0xf] %v1652_v25  ;;  %s1741_s20 = scalar_lea.hbm %s3528_s5, %s2629_s28  ;;  %s1742_s11 = sshll.u32 %s3437_s8, 4  ;;  %s3461_s11 = int_to_ptr.vmem [resolvable:$true] %s1742_s11 }
 0x196   : > { %v1670_v29 = vsub.f32 %v1658_v26, %v1665_v27  ;;  %s1759_s9 = scalar_lea.hbm %s3529_s6, %s2629_s28  ;;  %s1705_s12 = sand.u32 1, %s3094_s27  }
 0x197   : > { %s1744_s7 = sshll.u32 %s1741_s20, 4  ;;  %s1760_s13 = sshll.u32 %s3393_s29, 4  ;;  %s1745_s7 = int_to_ptr.hbm [resolvable:$true] %s1744_s7  ;;  %s3465_s13 = int_to_ptr.vmem [resolvable:$true] %s1760_s13 }
 0x198   : > { %v1686_v32 = vsel %vm1497_vm0, %v1670_v29, %v1684_v9  ;;  %s1762_s1 = sshll.u32 %s1759_s9, 4  ;;  %s3470_s2 = scalar_lea.sflag [#allocation13], %s1705_s12  ;;  %s3467_s1 = int_to_ptr.hbm [resolvable:$true] %s1762_s1 }
 0x199   : > { %v1688_v33 = vpack.c.bf16 %v1686_v32, %v1686_v32  ;;  %s2906_s27 = sshra.s32 %s1745_s7, 4  ;;  %s2912_s3 = scalar_lea.hbm %s3528_s5, 32  ;;  %s2907_s27 = int_to_ptr.hbm [resolvable:$true] %s2906_s27 }
 0x19a   : > { %s2908_s10 = scalar_lea.hbm %s2907_s27, 16  ;;  %p2913_p2 = scmp.lt.s32.totalorder %s2907_s27, %s3528_s5 }
 0x19b   : > { %1690 = vst [vmem:[%s3437_s8 + $0x4] sm:$0xf] %v1688_v33  ;;  %p2909_p5 = scmp.ne.s32.totalorder %s2907_s27, %s2908_s10  ;;  %p2914_p1 = scmp.lt.s32.totalorder %s2912_s3, %s2908_s10 }
 0x19d   : > { %v1631_v28 = vpop.permute.xlu0 %1630  ;;  %v1667_v61 = vpop.permute.xlu1 %1666  ;;  %p2910_p7 = pnand %p2909_p5, %p3156_p3  ;;  %p2915_p4 = por %p2914_p1, %p2913_p2 }
 0x19e   : > { %v1635_v35 = vsub.f32 %v1623_v18, %v1631_v28  ;;  %v1671_v20 = vsub.f32 %v1659_v19, %v1667_v61 }
 0x19f   : > { %p2911_p9 = pneg %p2910_p7 }
 0x1a0   : > { %v1651_v37 = vsel %vm1497_vm0, %v1635_v35, %v1649_v34 }
 0x1a1   : > { %v1653_v38 = vpack.c.bf16 %v1651_v37, %v1651_v37  ;;  %p2916_p8 = pnand %p2915_p4, %p2911_p9 }
 0x1a3   : > { %1655 = vst [vmem:[%s3437_s8 + $0x8] sm:$0xf] %v1653_v38 }
 0x1a5   : > { %v1681_v39 = vpop.permute.xlu0 %1680 }
 0x1a6   : > { %v1685_v6 = vadd.f32 %v1681_v39, %v1673_v30 }
 0x1a8   : > { %v1687_v45 = vsel %vm1497_vm0, %v1671_v20, %v1685_v6 }
 0x1a9   : > { %v1689_v42 = vpack.c.bf16 %v1687_v45, %v1687_v45 }
 0x1ab   : > { %1691 = vst [vmem:[%s3437_s8 + $0xc] sm:$0xf] %v1689_v42 }
 0x1ac   : > { %2919 = shalt.err (!%p2916_p8)
}
 0x1ad   : > { %s3026_s8 = smov 128   ;;  %s3027_s19 = smov 8  }
 0x1ae   : > { %2647 = dma.vmem_to_hbm [thread:$0]  (%p3156_p3), %s3461_s11, 256, %s1745_s7, %s3470_s2, %s3026_s8, %s3026_s8, %s3027_s19  }
 0x1af   : > { %s2934_s20 = sshra.s32 %s3467_s1, 4  ;;  %s2940_s12 = scalar_lea.hbm %s3529_s6, 32  ;;  %s2935_s20 = int_to_ptr.hbm [resolvable:$true] %s2934_s20 }
 0x1b0   : > { %s2936_s14 = scalar_lea.hbm %s2935_s20, 16  ;;  %p2941_p0 = scmp.lt.s32.totalorder %s2935_s20, %s3529_s6 }
 0x1b1   : > { %p2937_p10 = scmp.ne.s32.totalorder %s2935_s20, %s2936_s14  ;;  %p2942_p5 = scmp.lt.s32.totalorder %s2940_s12, %s2936_s14 }
 0x1b3   : > { %p2938_p12 = pnand %p2937_p10, %p3156_p3  ;;  %p2943_p7 = por %p2942_p5, %p2941_p0 }
 0x1b5   : > { %p2939_p13 = pneg %p2938_p12 }
 0x1b7   : > { %p2944_p9 = pnand %p2943_p7, %p2939_p13 }
 0x1b9   : > { %2947 = shalt.err (!%p2944_p9)
}
 0x1ba   : > { %2648 = dma.vmem_to_hbm [thread:$0]  (%p3156_p3), %s3465_s13, 256, %s3467_s1, %s3470_s2, %s3026_s8, %s3026_s8, %s3027_s19  }
 0x1bb PF: > { %s1777_s11 = sand.u32 1, %s2994_s21   ;;  %p2667_p2 = pnand %p1947_p11, %p3110_p6 }
 0x1bc   : > { %s1778_s7 = scalar_lea.sflag [#allocation5], %s1777_s11 }
 0x1bd   : > { %p2668_p1 = pneg %p2667_p2 }
 0x1bf   : > { %2985 = dma.done.wait (%p2668_p1), %s1778_s7, 512  }
 0x1c0   : > { %2987 = vsyncadd (%p2668_p1), %s1778_s7, 4294966784  ;;  %s3549_s29 = sadd.s32 4294967294, %s3014_s26  }
 0x1c1   : > { %s1787_s17 = sand.u32 1, %s3549_s29  }
 0x1c2   : > { %s1788_s16 = scalar_lea.sflag [#allocation13], %s1787_s17 }
 0x1c3   : > { %2989 = dma.done.wait (%p2668_p1), %s1788_s16, 512  }
 0x1c4   : > { %2991 = vsyncadd (%p2668_p1), %s1788_s16, 4294966784  ;;  %s28_s26 = sadd.s32 1, %s3014_s26   ;;  %s3550_s30 = sld [smem:[#allocation20_spill]] }
 0x1c5   : > { %p25_p3 = scmp.ge.s32.totalorder %s28_s26, 4   ;;  %s3551_s21 = smov %s2998_s22 }
 0x1c6   : > { %s3552_s22 = smov %s3002_s23  ;;  %s3553_s23 = smov %s3172_s15 }
 0x1c7   : > { %s3554_s24 = smov %s3010_s25  ;;  %27 = sbr.rel (!%p25_p3) target bundleno = 14 (0xe), region = 134 }
 0x1ca   : > { %s3555_s25 = smov %s3550_s30 }
 0x1cc   :  { %1804 = vsyncpa [#allocation4], 1 }
 0x1cd   :  { %1806 = vsyncpa [#allocation4 + $0x1], 1 }
 0x1ce   :  { %1807 = vsyncpa [#allocation7], 1 }
 0x1cf   :  { %1808 = vsyncpa [#allocation10], 1 }
 0x1d0   :  { %1809 = vsyncpa [#allocation5], 1 }
 0x1d1   :  { %1811 = vsyncpa [#allocation5 + $0x1], 1 }
 0x1d2   :  { %1812 = vsyncpa [#allocation13], 1 }
 0x1d3   :  { %1814 = vsyncpa [#allocation13 + $0x1], 1 }

</bundles_post_ra>
